<compile_context>
chip_gen: v7x
topology: tpu7x:2x2x1
jax: 0.10.0
libtpu: 0.0.40
codegen_flags: <defaults>
</compile_context>

<pallas_src>
import functools

import jax
import jax.numpy as jnp
from jax import lax
from jax.experimental import pallas as pl
from jax.experimental.pallas import tpu as pltpu


def mha_kernel(q_ref, k_ref, v_ref, t_ref, gamma_ref, beta_ref, wpt_ref,
               o_ref, vn_ref, *, num_heads, eps, scale, n_valid, max_k, mxu_dtype):
    qi = pl.program_id(1)
    TQ = q_ref.shape[2]          # query rows in this tile
    Np = k_ref.shape[2]          # (possibly padded) key length
    E = v_ref.shape[2]
    d = q_ref.shape[3]
    C = 2 * max_k + 1

    # --- LayerNorm(v) over embed dim, once per batch (qi == 0), kept in VMEM scratch ---
    @pl.when(qi == 0)
    def _():
        v = v_ref[0].astype(jnp.float32)                        # (Np, E)
        mean = jnp.mean(v, axis=-1, keepdims=True)
        var = jnp.mean((v - mean) ** 2, axis=-1, keepdims=True)
        vn_ref[...] = ((v - mean) * lax.rsqrt(var + eps)
                       * gamma_ref[...].astype(jnp.float32)
                       + beta_ref[...].astype(jnp.float32))

    vn = vn_ref[...]                                            # (Np, E) f32

    # --- relative-position index for this query tile (head-independent) ---
    row = lax.broadcasted_iota(jnp.int32, (TQ, Np), 0) + qi * TQ
    col = lax.broadcasted_iota(jnp.int32, (TQ, Np), 1)
    rel = jnp.clip(col - row, -max_k, max_k) + max_k            # values in [0, 2K]
    masks = [rel == c for c in range(C)]                        # C bool (TQ, Np) masks

    padded = Np != n_valid                                      # static Python bool
    if padded:
        key_ok = col < n_valid

    # --- per-head attention, accumulating directly into the projected output ---
    out = jnp.zeros((TQ, E), jnp.float32)
    for h in range(num_heads):
        lo = h * d
        qh = (q_ref[0, h].astype(jnp.float32) * scale).astype(mxu_dtype)   # (TQ, d)
        kh = k_ref[0, h].astype(mxu_dtype)                                  # (Np, d)

        # content scores on the MXU: (TQ, Np)
        s = lax.dot_general(qh, kh, (((1,), (1,)), ((), ())),
                            preferred_element_type=jnp.float32)

        # relative-position bias: (2K+1)-way select-sum against the tiny t table
        t_h = t_ref[0, h].astype(jnp.float32)                   # (TQ, C), scale folded
        for c in range(C):
            s = s + jnp.where(masks[c], t_h[:, c:c + 1], 0.0)

        if padded:
            s = jnp.where(key_ok, s, -1e30)

        # softmax over keys (f32); divide goes to the EUP
        s = s - jnp.max(s, axis=-1, keepdims=True)
        p = jnp.exp(s)
        p = p * pl.reciprocal(jnp.sum(p, axis=-1, keepdims=True), approx=True)

        vh = vn[:, lo:lo + d].astype(mxu_dtype)                 # (Np, d)
        head = jnp.dot(p.astype(mxu_dtype), vh,
                       preferred_element_type=jnp.float32)      # (TQ, d)
        # fold the output projection in per head: attn @ W_proj^T, accumulated in f32
        out = out + jnp.dot(head.astype(mxu_dtype),
                            wpt_ref[lo:lo + d, :].astype(mxu_dtype),
                            preferred_element_type=jnp.float32)

    o_ref[0] = out.astype(o_ref.dtype)


def multi_head_attention(q, k, v, emb, gamma, beta, wpt, num_heads, max_k,
                         mxu_dtype=jnp.bfloat16):
    B, N, E = q.shape
    d = E // num_heads
    scale = float(d) ** -0.5
    C = 2 * max_k + 1

    # head-major q, k: (B, H, N, d) -> per-head kernel reads are whole blocks
    q_hm = jnp.transpose(q.reshape(B, N, num_heads, d), (0, 2, 1, 3))
    k_hm = jnp.transpose(k.reshape(B, N, num_heads, d), (0, 2, 1, 3))

    # tiny relative-position table: t[b,h,n,c] = scale * <q_head[b,h,n], emb[c]>
    t = jnp.einsum('bhnd,cd->bhnc', q_hm.astype(jnp.float32),
                   emb.astype(jnp.float32), precision='highest') * scale   # (B,H,N,C)

    # Query tiling: 128-row tiles; pad N up to a multiple of 128 when needed
    # (sweep TQ to 256/512 on v5e/v6e if VMEM allows).
    if N <= 128:
        TQ, Np = N, N
    else:
        TQ = 128
        Np = ((N + TQ - 1) // TQ) * TQ
    if Np != N:
        pad = Np - N
        q_hm = jnp.pad(q_hm, ((0, 0), (0, 0), (0, pad), (0, 0)))
        k_hm = jnp.pad(k_hm, ((0, 0), (0, 0), (0, pad), (0, 0)))
        v_p = jnp.pad(v, ((0, 0), (0, pad), (0, 0)))
        t = jnp.pad(t, ((0, 0), (0, 0), (0, pad), (0, 0)))
    else:
        v_p = v
    nqt = Np // TQ

    kernel = functools.partial(mha_kernel, num_heads=num_heads, eps=1e-5,
                               scale=scale, n_valid=N, max_k=max_k,
                               mxu_dtype=mxu_dtype)

    # --- VMEM budgeting (set unconditionally; v5e default scoped limit is 16 MiB) ---
    # double-buffered input/output blocks:
    blk_bytes = 4 * (TQ * E            # q (head-major, same element count)
                     + 2 * Np * E      # k, v
                     + num_heads * TQ * C
                     + 2 * E           # gamma, beta
                     + E * E           # W_proj^T
                     + TQ * E)         # out block
    # kernel-internal temporaries: vn scratch, s/p, masks, accumulators, misc
    internal = 4 * (Np * E + 2 * TQ * Np + C * TQ * Np + 2 * TQ * E) + (2 << 20)
    needed = 2 * blk_bytes + internal
    try:
        cap = int(pltpu.get_tpu_info().vmem_capacity_bytes)
    except Exception:
        cap = 64 << 20
    vmem_limit = int(min(max(needed, 32 << 20), int(cap * 0.9)))

    out = pl.pallas_call(
        kernel,
        out_shape=jax.ShapeDtypeStruct((B, Np, E), q.dtype),
        grid_spec=pltpu.PrefetchScalarGridSpec(
            num_scalar_prefetch=0,
            grid=(B, nqt),
            in_specs=[
                pl.BlockSpec((1, num_heads, TQ, d), lambda b, qi: (b, 0, qi, 0)),  # q
                pl.BlockSpec((1, num_heads, Np, d), lambda b, qi: (b, 0, 0, 0)),   # k
                pl.BlockSpec((1, Np, E), lambda b, qi: (b, 0, 0)),                 # v
                pl.BlockSpec((1, num_heads, TQ, C), lambda b, qi: (b, 0, qi, 0)),  # t
                pl.BlockSpec((1, E), lambda b, qi: (0, 0)),                        # gamma
                pl.BlockSpec((1, E), lambda b, qi: (0, 0)),                        # beta
                pl.BlockSpec((E, E), lambda b, qi: (0, 0)),                        # W^T
            ],
            out_specs=pl.BlockSpec((1, TQ, E), lambda b, qi: (b, qi, 0)),
            scratch_shapes=[pltpu.VMEM((Np, E), jnp.float32)],                     # vn
        ),
        compiler_params=pltpu.CompilerParams(
            dimension_semantics=("parallel", "arbitrary"),
            vmem_limit_bytes=vmem_limit),
    )(q_hm, k_hm, v_p, t, gamma, beta, wpt)

    return out if Np == N else out[:, :N, :]


if __name__ == "__main__":
    B, N, E, H, MAX_K = 2, 8, 32, 4, 4
    d = E // H

    key = jax.random.PRNGKey(0)
    kq, kk, kv, ke, kw = jax.random.split(key, 5)

    # inputs (q, k, v): (B, N, E)
    q = jax.random.normal(kq, (B, N, E), jnp.float32)
    k = jax.random.normal(kk, (B, N, E), jnp.float32)
    v = jax.random.normal(kv, (B, N, E), jnp.float32)

    # parameters, deterministic in-script init:
    #   nn.Embedding(2*max_k+1, d) default N(0,1); proj Linear trunc_normal std=0.02;
    #   LayerNorm gamma=1, beta=0.  torch Linear stores W; we pass W^T.
    emb = jax.random.normal(ke, (2 * MAX_K + 1, d), jnp.float32)
    wp = 0.02 * jax.random.truncated_normal(kw, -2.0, 2.0, (E, E), jnp.float32)
    gamma = jnp.ones((1, E), jnp.float32)
    beta = jnp.zeros((1, E), jnp.float32)
    wpt = wp.T

    # plain-JAX reference of the PyTorch forward
    pos = jnp.clip(jnp.arange(N)[None, :] - jnp.arange(N)[:, None], -MAX_K, MAX_K) + MAX_K

    def reference(q, k, v):
        rpe = emb[pos]                                         # (N, N, d)
        mean = v.mean(-1, keepdims=True)
        var = ((v - mean) ** 2).mean(-1, keepdims=True)
        vn = (v - mean) / jnp.sqrt(var + 1e-5) * gamma + beta
        qh = q.reshape(B, N, H, d).transpose(0, 2, 1, 3).reshape(B * H, N, d)
        kh = k.reshape(B, N, H, d).transpose(0, 2, 1, 3).reshape(B * H, N, d)
        vh = vn.reshape(B, N, H, d).transpose(0, 2, 1, 3).reshape(B * H, N, d)
        scale = d ** -0.5
        s = jnp.einsum('bnd,bmd->bnm', qh, kh, precision='highest') * scale
        s = s + jnp.einsum('bnd,nmd->bnm', qh, rpe, precision='highest') * scale
        a = jax.nn.softmax(s, axis=-1)
        o = jnp.einsum('bnm,bmd->bnd', a, vh, precision='highest')
        o = o.reshape(B, H, N, d).transpose(0, 2, 1, 3).reshape(B, N, E)
        return jnp.dot(o, wp.T, precision='highest')

    expected = reference(q, k, v)

    # f32 MXU path: exact module semantics (tight tolerance)
    out_f32 = multi_head_attention(q, k, v, emb, gamma, beta, wpt, H, MAX_K,
                                   mxu_dtype=jnp.float32)
    out_f32 = jax.block_until_ready(out_f32)
    assert jnp.allclose(out_f32, expected, atol=1e-3, rtol=1e-3), "f32 mismatch"

    # bf16 MXU operands (f32 accumulation): performance path, looser tolerance
    out_bf16 = multi_head_attention(q, k, v, emb, gamma, beta, wpt, H, MAX_K,
                                    mxu_dtype=jnp.bfloat16)
    out_bf16 = jax.block_until_ready(out_bf16)
    assert jnp.allclose(out_bf16, expected, atol=2e-2, rtol=2e-2), "bf16 mismatch"

    print("KERNEL_OK")
</pallas_src>

<mosaic_0001>
module attributes {stable_mosaic.version = 11 : i64} {
  func.func @mha_kernel(%arg0: i32, %arg1: i32, %arg2: memref<1x4x8x8xf32, #tpu.memory_space<vmem>>, %arg3: memref<1x4x8x8xf32, #tpu.memory_space<vmem>>, %arg4: memref<1x8x32xf32, #tpu.memory_space<vmem>>, %arg5: memref<1x4x8x9xf32, #tpu.memory_space<vmem>>, %arg6: memref<1x32xf32, #tpu.memory_space<vmem>>, %arg7: memref<1x32xf32, #tpu.memory_space<vmem>>, %arg8: memref<32x32xf32, #tpu.memory_space<vmem>>, %arg9: memref<1x8x32xf32, #tpu.memory_space<vmem>>, %arg10: memref<8x32xf32, #tpu.memory_space<vmem>>) attributes {dimension_semantics = [#tpu.dimension_semantics<parallel>, #tpu.dimension_semantics<arbitrary>], iteration_bounds = array<i64: 2, 1>, scalar_prefetch = 0 : i64, scratch_operands = 1 : i64, tpu.core_type = #tpu.core_type<tc>, window_params = [{transform_indices = @transform_0, window_bounds = array<i64: 1, 4, 8, 8>}, {transform_indices = @transform_1, window_bounds = array<i64: 1, 4, 8, 8>}, {transform_indices = @transform_2, window_bounds = array<i64: 1, 8, 32>}, {transform_indices = @transform_3, window_bounds = array<i64: 1, 4, 8, 9>}, {pipeline_mode = #tpu.pipeline_mode<synchronous>, transform_indices = @transform_4, window_bounds = array<i64: 1, 32>}, {pipeline_mode = #tpu.pipeline_mode<synchronous>, transform_indices = @transform_5, window_bounds = array<i64: 1, 32>}, {pipeline_mode = #tpu.pipeline_mode<synchronous>, transform_indices = @transform_6, window_bounds = array<i64: 32, 32>}, {transform_indices = @transform_7, window_bounds = array<i64: 1, 8, 32>}]} {
    %c0_i32 = arith.constant 0 : i32
    %0 = arith.cmpi eq, %arg1, %c0_i32 : i32
    %1 = arith.extui %0 : i1 to i32
    %c0_i32_0 = arith.constant 0 : i32
    %2 = arith.cmpi ne, %1, %c0_i32_0 : i32
    scf.if %2 {
      %c0_119 = arith.constant 0 : index
      %c0_120 = arith.constant 0 : index
      %c0_121 = arith.constant 0 : index
      %350 = vector.load %arg4[%c0_119, %c0_120, %c0_121] : memref<1x8x32xf32, #tpu.memory_space<vmem>>, vector<1x8x32xf32>
      %351 = vector.shape_cast %350 : vector<1x8x32xf32> to vector<8x32xf32>
      %cst_122 = arith.constant dense<0.000000e+00> : vector<8xf32>
      %352 = vector.multi_reduction <add>, %351, %cst_122 [1] : vector<8x32xf32> to vector<8xf32>
      %353 = vector.shape_cast %352 : vector<8xf32> to vector<8x1xf32>
      %cst_123 = arith.constant 3.200000e+01 : f32
      %354 = vector.broadcast %cst_123 : f32 to vector<8x1xf32>
      %355 = arith.divf %353, %354 : vector<8x1xf32>
      %356 = vector.broadcast %355 : vector<8x1xf32> to vector<8x32xf32>
      %357 = arith.subf %351, %356 : vector<8x32xf32>
      %358 = arith.mulf %357, %357 : vector<8x32xf32>
      %cst_124 = arith.constant dense<0.000000e+00> : vector<8xf32>
      %359 = vector.multi_reduction <add>, %358, %cst_124 [1] : vector<8x32xf32> to vector<8xf32>
      %360 = vector.shape_cast %359 : vector<8xf32> to vector<8x1xf32>
      %cst_125 = arith.constant 3.200000e+01 : f32
      %361 = vector.broadcast %cst_125 : f32 to vector<8x1xf32>
      %362 = arith.divf %360, %361 : vector<8x1xf32>
      %363 = vector.broadcast %355 : vector<8x1xf32> to vector<8x32xf32>
      %364 = arith.subf %351, %363 : vector<8x32xf32>
      %cst_126 = arith.constant 9.99999974E-6 : f32
      %365 = vector.broadcast %cst_126 : f32 to vector<8x1xf32>
      %366 = arith.addf %362, %365 : vector<8x1xf32>
      %367 = math.rsqrt %366 : vector<8x1xf32>
      %368 = vector.broadcast %367 : vector<8x1xf32> to vector<8x32xf32>
      %369 = arith.mulf %364, %368 : vector<8x32xf32>
      %c0_127 = arith.constant 0 : index
      %c0_128 = arith.constant 0 : index
      %370 = vector.load %arg6[%c0_127, %c0_128] : memref<1x32xf32, #tpu.memory_space<vmem>>, vector<1x32xf32>
      %371 = vector.broadcast %370 : vector<1x32xf32> to vector<8x32xf32>
      %372 = arith.mulf %369, %371 : vector<8x32xf32>
      %c0_129 = arith.constant 0 : index
      %c0_130 = arith.constant 0 : index
      %373 = vector.load %arg7[%c0_129, %c0_130] : memref<1x32xf32, #tpu.memory_space<vmem>>, vector<1x32xf32>
      %374 = vector.broadcast %373 : vector<1x32xf32> to vector<8x32xf32>
      %375 = arith.addf %372, %374 : vector<8x32xf32>
      %c0_131 = arith.constant 0 : index
      %c0_132 = arith.constant 0 : index
      %376 = vector.load %arg10[%c0_131, %c0_132] : memref<8x32xf32, #tpu.memory_space<vmem>>, vector<8x32xf32>
      tpu.vector_store %arg10[%c0_131, %c0_132], %375 {strides = array<i32>} : memref<8x32xf32, #tpu.memory_space<vmem>>, vector<8x32xf32>,
    } else {
    }
    %c0 = arith.constant 0 : index
    %c0_1 = arith.constant 0 : index
    %3 = vector.load %arg10[%c0, %c0_1] : memref<8x32xf32, #tpu.memory_space<vmem>>, vector<8x32xf32>
    %4 = tpu.iota {dimensions = array<i32: 0>} : vector<8x8xi32>
    %c8_i32 = arith.constant 8 : i32
    %5 = arith.muli %arg1, %c8_i32 : i32
    %6 = vector.broadcast %5 : i32 to vector<8x8xi32>
    %7 = arith.addi %4, %6 : vector<8x8xi32>
    %8 = tpu.iota {dimensions = array<i32: 1>} : vector<8x8xi32>
    %9 = arith.subi %8, %7 : vector<8x8xi32>
    %c-4_i32 = arith.constant -4 : i32
    %c4_i32 = arith.constant 4 : i32
    %10 = vector.broadcast %c-4_i32 : i32 to vector<8x8xi32>
    %11 = arith.maxsi %10, %9 : vector<8x8xi32>
    %12 = vector.broadcast %c4_i32 : i32 to vector<8x8xi32>
    %13 = arith.minsi %12, %11 : vector<8x8xi32>
    %c4_i32_2 = arith.constant 4 : i32
    %14 = vector.broadcast %c4_i32_2 : i32 to vector<8x8xi32>
    %15 = arith.addi %13, %14 : vector<8x8xi32>
    %c0_i32_3 = arith.constant 0 : i32
    %16 = vector.broadcast %c0_i32_3 : i32 to vector<8x8xi32>
    %17 = arith.cmpi eq, %15, %16 : vector<8x8xi32>
    %c1_i32 = arith.constant 1 : i32
    %18 = vector.broadcast %c1_i32 : i32 to vector<8x8xi32>
    %19 = arith.cmpi eq, %15, %18 : vector<8x8xi32>
    %c2_i32 = arith.constant 2 : i32
    %20 = vector.broadcast %c2_i32 : i32 to vector<8x8xi32>
    %21 = arith.cmpi eq, %15, %20 : vector<8x8xi32>
    %c3_i32 = arith.constant 3 : i32
    %22 = vector.broadcast %c3_i32 : i32 to vector<8x8xi32>
    %23 = arith.cmpi eq, %15, %22 : vector<8x8xi32>
    %c4_i32_4 = arith.constant 4 : i32
    %24 = vector.broadcast %c4_i32_4 : i32 to vector<8x8xi32>
    %25 = arith.cmpi eq, %15, %24 : vector<8x8xi32>
    %c5_i32 = arith.constant 5 : i32
    %26 = vector.broadcast %c5_i32 : i32 to vector<8x8xi32>
    %27 = arith.cmpi eq, %15, %26 : vector<8x8xi32>
    %c6_i32 = arith.constant 6 : i32
    %28 = vector.broadcast %c6_i32 : i32 to vector<8x8xi32>
    %29 = arith.cmpi eq, %15, %28 : vector<8x8xi32>
    %c7_i32 = arith.constant 7 : i32
    %30 = vector.broadcast %c7_i32 : i32 to vector<8x8xi32>
    %31 = arith.cmpi eq, %15, %30 : vector<8x8xi32>
    %c8_i32_5 = arith.constant 8 : i32
    %32 = vector.broadcast %c8_i32_5 : i32 to vector<8x8xi32>
    %33 = arith.cmpi eq, %15, %32 : vector<8x8xi32>
    %cst = arith.constant 0.000000e+00 : f32
    %34 = vector.broadcast %cst : f32 to vector<8x32xf32>
    %c0_6 = arith.constant 0 : index
    %c0_7 = arith.constant 0 : index
    %c0_8 = arith.constant 0 : index
    %c0_9 = arith.constant 0 : index
    %35 = vector.load %arg2[%c0_6, %c0_7, %c0_8, %c0_9] : memref<1x4x8x8xf32, #tpu.memory_space<vmem>>, vector<1x1x8x8xf32>
    %36 = vector.shape_cast %35 : vector<1x1x8x8xf32> to vector<8x8xf32>
    %cst_10 = arith.constant 0.353553385 : f32
    %37 = vector.broadcast %cst_10 : f32 to vector<8x8xf32>
    %38 = arith.mulf %36, %37 : vector<8x8xf32>
    %c0_11 = arith.constant 0 : index
    %c0_12 = arith.constant 0 : index
    %c0_13 = arith.constant 0 : index
    %c0_14 = arith.constant 0 : index
    %39 = vector.load %arg3[%c0_11, %c0_12, %c0_13, %c0_14] : memref<1x4x8x8xf32, #tpu.memory_space<vmem>>, vector<1x1x8x8xf32>
    %40 = vector.shape_cast %39 : vector<1x1x8x8xf32> to vector<8x8xf32>
    %cst_15 = arith.constant dense<0.000000e+00> : vector<8x8xf32>
    %41 = tpu.matmul %38, %40, %cst_15 {dimension_numbers = #tpu.dot_dimension_numbers<[1], [1], [0], [0], [0, 0, 1, 0], [], []>} : vector<8x8xf32>, vector<8x8xf32>, vector<8x8xf32> -> vector<8x8xf32>
    %c0_16 = arith.constant 0 : index
    %c0_17 = arith.constant 0 : index
    %c0_18 = arith.constant 0 : index
    %c0_19 = arith.constant 0 : index
    %42 = vector.load %arg5[%c0_16, %c0_17, %c0_18, %c0_19] : memref<1x4x8x9xf32, #tpu.memory_space<vmem>>, vector<1x1x8x9xf32>
    %43 = vector.shape_cast %42 : vector<1x1x8x9xf32> to vector<8x9xf32>
    %44 = vector.extract_strided_slice %43 {offsets = [0, 0], sizes = [8, 1], strides = [1, 1]} : vector<8x9xf32> to vector<8x1xf32>
    %cst_20 = arith.constant 0.000000e+00 : f32
    %45 = vector.shape_cast %44 : vector<8x1xf32> to vector<8x1xf32>
    %46 = vector.broadcast %45 : vector<8x1xf32> to vector<8x8xf32>
    %47 = vector.broadcast %cst_20 : f32 to vector<8x8xf32>
    %48 = arith.select %17, %46, %47 : vector<8x8xi1>, vector<8x8xf32>
    %49 = arith.addf %41, %48 : vector<8x8xf32>
    %50 = vector.extract_strided_slice %43 {offsets = [0, 1], sizes = [8, 1], strides = [1, 1]} : vector<8x9xf32> to vector<8x1xf32>
    %cst_21 = arith.constant 0.000000e+00 : f32
    %51 = vector.shape_cast %50 : vector<8x1xf32> to vector<8x1xf32>
    %52 = vector.broadcast %51 : vector<8x1xf32> to vector<8x8xf32>
    %53 = vector.broadcast %cst_21 : f32 to vector<8x8xf32>
    %54 = arith.select %19, %52, %53 : vector<8x8xi1>, vector<8x8xf32>
    %55 = arith.addf %49, %54 : vector<8x8xf32>
    %56 = vector.extract_strided_slice %43 {offsets = [0, 2], sizes = [8, 1], strides = [1, 1]} : vector<8x9xf32> to vector<8x1xf32>
    %cst_22 = arith.constant 0.000000e+00 : f32
    %57 = vector.shape_cast %56 : vector<8x1xf32> to vector<8x1xf32>
    %58 = vector.broadcast %57 : vector<8x1xf32> to vector<8x8xf32>
    %59 = vector.broadcast %cst_22 : f32 to vector<8x8xf32>
    %60 = arith.select %21, %58, %59 : vector<8x8xi1>, vector<8x8xf32>
    %61 = arith.addf %55, %60 : vector<8x8xf32>
    %62 = vector.extract_strided_slice %43 {offsets = [0, 3], sizes = [8, 1], strides = [1, 1]} : vector<8x9xf32> to vector<8x1xf32>
    %cst_23 = arith.constant 0.000000e+00 : f32
    %63 = vector.shape_cast %62 : vector<8x1xf32> to vector<8x1xf32>
    %64 = vector.broadcast %63 : vector<8x1xf32> to vector<8x8xf32>
    %65 = vector.broadcast %cst_23 : f32 to vector<8x8xf32>
    %66 = arith.select %23, %64, %65 : vector<8x8xi1>, vector<8x8xf32>
    %67 = arith.addf %61, %66 : vector<8x8xf32>
    %68 = vector.extract_strided_slice %43 {offsets = [0, 4], sizes = [8, 1], strides = [1, 1]} : vector<8x9xf32> to vector<8x1xf32>
    %cst_24 = arith.constant 0.000000e+00 : f32
    %69 = vector.shape_cast %68 : vector<8x1xf32> to vector<8x1xf32>
    %70 = vector.broadcast %69 : vector<8x1xf32> to vector<8x8xf32>
    %71 = vector.broadcast %cst_24 : f32 to vector<8x8xf32>
    %72 = arith.select %25, %70, %71 : vector<8x8xi1>, vector<8x8xf32>
    %73 = arith.addf %67, %72 : vector<8x8xf32>
    %74 = vector.extract_strided_slice %43 {offsets = [0, 5], sizes = [8, 1], strides = [1, 1]} : vector<8x9xf32> to vector<8x1xf32>
    %cst_25 = arith.constant 0.000000e+00 : f32
    %75 = vector.shape_cast %74 : vector<8x1xf32> to vector<8x1xf32>
    %76 = vector.broadcast %75 : vector<8x1xf32> to vector<8x8xf32>
    %77 = vector.broadcast %cst_25 : f32 to vector<8x8xf32>
    %78 = arith.select %27, %76, %77 : vector<8x8xi1>, vector<8x8xf32>
    %79 = arith.addf %73, %78 : vector<8x8xf32>
    %80 = vector.extract_strided_slice %43 {offsets = [0, 6], sizes = [8, 1], strides = [1, 1]} : vector<8x9xf32> to vector<8x1xf32>
    %cst_26 = arith.constant 0.000000e+00 : f32
    %81 = vector.shape_cast %80 : vector<8x1xf32> to vector<8x1xf32>
    %82 = vector.broadcast %81 : vector<8x1xf32> to vector<8x8xf32>
    %83 = vector.broadcast %cst_26 : f32 to vector<8x8xf32>
    %84 = arith.select %29, %82, %83 : vector<8x8xi1>, vector<8x8xf32>
    %85 = arith.addf %79, %84 : vector<8x8xf32>
    %86 = vector.extract_strided_slice %43 {offsets = [0, 7], sizes = [8, 1], strides = [1, 1]} : vector<8x9xf32> to vector<8x1xf32>
    %cst_27 = arith.constant 0.000000e+00 : f32
    %87 = vector.shape_cast %86 : vector<8x1xf32> to vector<8x1xf32>
    %88 = vector.broadcast %87 : vector<8x1xf32> to vector<8x8xf32>
    %89 = vector.broadcast %cst_27 : f32 to vector<8x8xf32>
    %90 = arith.select %31, %88, %89 : vector<8x8xi1>, vector<8x8xf32>
    %91 = arith.addf %85, %90 : vector<8x8xf32>
    %92 = vector.extract_strided_slice %43 {offsets = [0, 8], sizes = [8, 1], strides = [1, 1]} : vector<8x9xf32> to vector<8x1xf32>
    %cst_28 = arith.constant 0.000000e+00 : f32
    %93 = vector.shape_cast %92 : vector<8x1xf32> to vector<8x1xf32>
    %94 = vector.broadcast %93 : vector<8x1xf32> to vector<8x8xf32>
    %95 = vector.broadcast %cst_28 : f32 to vector<8x8xf32>
    %96 = arith.select %33, %94, %95 : vector<8x8xi1>, vector<8x8xf32>
    %97 = arith.addf %91, %96 : vector<8x8xf32>
    %cst_29 = arith.constant dense<0xFF800000> : vector<8xf32>
    %98 = vector.multi_reduction <maximumf>, %97, %cst_29 [1] : vector<8x8xf32> to vector<8xf32>
    %99 = vector.shape_cast %98 : vector<8xf32> to vector<8x1xf32>
    %100 = vector.broadcast %99 : vector<8x1xf32> to vector<8x8xf32>
    %101 = arith.subf %97, %100 : vector<8x8xf32>
    %102 = math.exp %101 : vector<8x8xf32>
    %cst_30 = arith.constant dense<0.000000e+00> : vector<8xf32>
    %103 = vector.multi_reduction <add>, %102, %cst_30 [1] : vector<8x8xf32> to vector<8xf32>
    %104 = vector.shape_cast %103 : vector<8xf32> to vector<8x1xf32>
    %105 = tpu.reciprocal %104 {approx = true} : vector<8x1xf32> -> vector<8x1xf32>
    %106 = vector.broadcast %105 : vector<8x1xf32> to vector<8x8xf32>
    %107 = arith.mulf %102, %106 : vector<8x8xf32>
    %108 = vector.extract_strided_slice %3 {offsets = [0, 0], sizes = [8, 8], strides = [1, 1]} : vector<8x32xf32> to vector<8x8xf32>
    %cst_31 = arith.constant dense<0.000000e+00> : vector<8x8xf32>
    %109 = tpu.matmul %107, %108, %cst_31 {dimension_numbers = #tpu.dot_dimension_numbers<[1], [0], [0], [1], [0, 0, 1, 1], [], []>} : vector<8x8xf32>, vector<8x8xf32>, vector<8x8xf32> -> vector<8x8xf32>
    %c0_32 = arith.constant 0 : index
    %c0_33 = arith.constant 0 : index
    %110 = vector.load %arg8[%c0_32, %c0_33] : memref<32x32xf32, #tpu.memory_space<vmem>>, vector<8x32xf32>
    %cst_34 = arith.constant dense<0.000000e+00> : vector<8x32xf32>
    %111 = tpu.matmul %109, %110, %cst_34 {dimension_numbers = #tpu.dot_dimension_numbers<[1], [0], [0], [1], [0, 0, 1, 1], [], []>} : vector<8x8xf32>, vector<8x32xf32>, vector<8x32xf32> -> vector<8x32xf32>
    %112 = arith.addf %34, %111 : vector<8x32xf32>
    %c0_35 = arith.constant 0 : index
    %c1 = arith.constant 1 : index
    %c0_36 = arith.constant 0 : index
    %c0_37 = arith.constant 0 : index
    %113 = vector.load %arg2[%c0_35, %c1, %c0_36, %c0_37] : memref<1x4x8x8xf32, #tpu.memory_space<vmem>>, vector<1x1x8x8xf32>
    %114 = vector.shape_cast %113 : vector<1x1x8x8xf32> to vector<8x8xf32>
    %cst_38 = arith.constant 0.353553385 : f32
    %115 = vector.broadcast %cst_38 : f32 to vector<8x8xf32>
    %116 = arith.mulf %114, %115 : vector<8x8xf32>
    %c0_39 = arith.constant 0 : index
    %c1_40 = arith.constant 1 : index
    %c0_41 = arith.constant 0 : index
    %c0_42 = arith.constant 0 : index
    %117 = vector.load %arg3[%c0_39, %c1_40, %c0_41, %c0_42] : memref<1x4x8x8xf32, #tpu.memory_space<vmem>>, vector<1x1x8x8xf32>
    %118 = vector.shape_cast %117 : vector<1x1x8x8xf32> to vector<8x8xf32>
    %cst_43 = arith.constant dense<0.000000e+00> : vector<8x8xf32>
    %119 = tpu.matmul %116, %118, %cst_43 {dimension_numbers = #tpu.dot_dimension_numbers<[1], [1], [0], [0], [0, 0, 1, 0], [], []>} : vector<8x8xf32>, vector<8x8xf32>, vector<8x8xf32> -> vector<8x8xf32>
    %c0_44 = arith.constant 0 : index
    %c1_45 = arith.constant 1 : index
    %c0_46 = arith.constant 0 : index
    %c0_47 = arith.constant 0 : index
    %120 = vector.load %arg5[%c0_44, %c1_45, %c0_46, %c0_47] : memref<1x4x8x9xf32, #tpu.memory_space<vmem>>, vector<1x1x8x9xf32>
    %121 = vector.shape_cast %120 : vector<1x1x8x9xf32> to vector<8x9xf32>
    %122 = vector.extract_strided_slice %121 {offsets = [0, 0], sizes = [8, 1], strides = [1, 1]} : vector<8x9xf32> to vector<8x1xf32>
    %cst_48 = arith.constant 0.000000e+00 : f32
    %123 = vector.shape_cast %122 : vector<8x1xf32> to vector<8x1xf32>
    %124 = vector.broadcast %123 : vector<8x1xf32> to vector<8x8xf32>
    %125 = vector.broadcast %cst_48 : f32 to vector<8x8xf32>
    %126 = arith.select %17, %124, %125 : vector<8x8xi1>, vector<8x8xf32>
    %127 = arith.addf %119, %126 : vector<8x8xf32>
    %128 = vector.extract_strided_slice %121 {offsets = [0, 1], sizes = [8, 1], strides = [1, 1]} : vector<8x9xf32> to vector<8x1xf32>
    %cst_49 = arith.constant 0.000000e+00 : f32
    %129 = vector.shape_cast %128 : vector<8x1xf32> to vector<8x1xf32>
    %130 = vector.broadcast %129 : vector<8x1xf32> to vector<8x8xf32>
    %131 = vector.broadcast %cst_49 : f32 to vector<8x8xf32>
    %132 = arith.select %19, %130, %131 : vector<8x8xi1>, vector<8x8xf32>
    %133 = arith.addf %127, %132 : vector<8x8xf32>
    %134 = vector.extract_strided_slice %121 {offsets = [0, 2], sizes = [8, 1], strides = [1, 1]} : vector<8x9xf32> to vector<8x1xf32>
    %cst_50 = arith.constant 0.000000e+00 : f32
    %135 = vector.shape_cast %134 : vector<8x1xf32> to vector<8x1xf32>
    %136 = vector.broadcast %135 : vector<8x1xf32> to vector<8x8xf32>
    %137 = vector.broadcast %cst_50 : f32 to vector<8x8xf32>
    %138 = arith.select %21, %136, %137 : vector<8x8xi1>, vector<8x8xf32>
    %139 = arith.addf %133, %138 : vector<8x8xf32>
    %140 = vector.extract_strided_slice %121 {offsets = [0, 3], sizes = [8, 1], strides = [1, 1]} : vector<8x9xf32> to vector<8x1xf32>
    %cst_51 = arith.constant 0.000000e+00 : f32
    %141 = vector.shape_cast %140 : vector<8x1xf32> to vector<8x1xf32>
    %142 = vector.broadcast %141 : vector<8x1xf32> to vector<8x8xf32>
    %143 = vector.broadcast %cst_51 : f32 to vector<8x8xf32>
    %144 = arith.select %23, %142, %143 : vector<8x8xi1>, vector<8x8xf32>
    %145 = arith.addf %139, %144 : vector<8x8xf32>
    %146 = vector.extract_strided_slice %121 {offsets = [0, 4], sizes = [8, 1], strides = [1, 1]} : vector<8x9xf32> to vector<8x1xf32>
    %cst_52 = arith.constant 0.000000e+00 : f32
    %147 = vector.shape_cast %146 : vector<8x1xf32> to vector<8x1xf32>
    %148 = vector.broadcast %147 : vector<8x1xf32> to vector<8x8xf32>
    %149 = vector.broadcast %cst_52 : f32 to vector<8x8xf32>
    %150 = arith.select %25, %148, %149 : vector<8x8xi1>, vector<8x8xf32>
    %151 = arith.addf %145, %150 : vector<8x8xf32>
    %152 = vector.extract_strided_slice %121 {offsets = [0, 5], sizes = [8, 1], strides = [1, 1]} : vector<8x9xf32> to vector<8x1xf32>
    %cst_53 = arith.constant 0.000000e+00 : f32
    %153 = vector.shape_cast %152 : vector<8x1xf32> to vector<8x1xf32>
    %154 = vector.broadcast %153 : vector<8x1xf32> to vector<8x8xf32>
    %155 = vector.broadcast %cst_53 : f32 to vector<8x8xf32>
    %156 = arith.select %27, %154, %155 : vector<8x8xi1>, vector<8x8xf32>
    %157 = arith.addf %151, %156 : vector<8x8xf32>
    %158 = vector.extract_strided_slice %121 {offsets = [0, 6], sizes = [8, 1], strides = [1, 1]} : vector<8x9xf32> to vector<8x1xf32>
    %cst_54 = arith.constant 0.000000e+00 : f32
    %159 = vector.shape_cast %158 : vector<8x1xf32> to vector<8x1xf32>
    %160 = vector.broadcast %159 : vector<8x1xf32> to vector<8x8xf32>
    %161 = vector.broadcast %cst_54 : f32 to vector<8x8xf32>
    %162 = arith.select %29, %160, %161 : vector<8x8xi1>, vector<8x8xf32>
    %163 = arith.addf %157, %162 : vector<8x8xf32>
    %164 = vector.extract_strided_slice %121 {offsets = [0, 7], sizes = [8, 1], strides = [1, 1]} : vector<8x9xf32> to vector<8x1xf32>
    %cst_55 = arith.constant 0.000000e+00 : f32
    %165 = vector.shape_cast %164 : vector<8x1xf32> to vector<8x1xf32>
    %166 = vector.broadcast %165 : vector<8x1xf32> to vector<8x8xf32>
    %167 = vector.broadcast %cst_55 : f32 to vector<8x8xf32>
    %168 = arith.select %31, %166, %167 : vector<8x8xi1>, vector<8x8xf32>
    %169 = arith.addf %163, %168 : vector<8x8xf32>
    %170 = vector.extract_strided_slice %121 {offsets = [0, 8], sizes = [8, 1], strides = [1, 1]} : vector<8x9xf32> to vector<8x1xf32>
    %cst_56 = arith.constant 0.000000e+00 : f32
    %171 = vector.shape_cast %170 : vector<8x1xf32> to vector<8x1xf32>
    %172 = vector.broadcast %171 : vector<8x1xf32> to vector<8x8xf32>
    %173 = vector.broadcast %cst_56 : f32 to vector<8x8xf32>
    %174 = arith.select %33, %172, %173 : vector<8x8xi1>, vector<8x8xf32>
    %175 = arith.addf %169, %174 : vector<8x8xf32>
    %cst_57 = arith.constant dense<0xFF800000> : vector<8xf32>
    %176 = vector.multi_reduction <maximumf>, %175, %cst_57 [1] : vector<8x8xf32> to vector<8xf32>
    %177 = vector.shape_cast %176 : vector<8xf32> to vector<8x1xf32>
    %178 = vector.broadcast %177 : vector<8x1xf32> to vector<8x8xf32>
    %179 = arith.subf %175, %178 : vector<8x8xf32>
    %180 = math.exp %179 : vector<8x8xf32>
    %cst_58 = arith.constant dense<0.000000e+00> : vector<8xf32>
    %181 = vector.multi_reduction <add>, %180, %cst_58 [1] : vector<8x8xf32> to vector<8xf32>
    %182 = vector.shape_cast %181 : vector<8xf32> to vector<8x1xf32>
    %183 = tpu.reciprocal %182 {approx = true} : vector<8x1xf32> -> vector<8x1xf32>
    %184 = vector.broadcast %183 : vector<8x1xf32> to vector<8x8xf32>
    %185 = arith.mulf %180, %184 : vector<8x8xf32>
    %186 = vector.extract_strided_slice %3 {offsets = [0, 8], sizes = [8, 8], strides = [1, 1]} : vector<8x32xf32> to vector<8x8xf32>
    %cst_59 = arith.constant dense<0.000000e+00> : vector<8x8xf32>
    %187 = tpu.matmul %185, %186, %cst_59 {dimension_numbers = #tpu.dot_dimension_numbers<[1], [0], [0], [1], [0, 0, 1, 1], [], []>} : vector<8x8xf32>, vector<8x8xf32>, vector<8x8xf32> -> vector<8x8xf32>
    %c8 = arith.constant 8 : index
    %c0_60 = arith.constant 0 : index
    %188 = vector.load %arg8[%c8, %c0_60] : memref<32x32xf32, #tpu.memory_space<vmem>>, vector<8x32xf32>
    %cst_61 = arith.constant dense<0.000000e+00> : vector<8x32xf32>
    %189 = tpu.matmul %187, %188, %cst_61 {dimension_numbers = #tpu.dot_dimension_numbers<[1], [0], [0], [1], [0, 0, 1, 1], [], []>} : vector<8x8xf32>, vector<8x32xf32>, vector<8x32xf32> -> vector<8x32xf32>
    %190 = arith.addf %112, %189 : vector<8x32xf32>
    %c0_62 = arith.constant 0 : index
    %c2 = arith.constant 2 : index
    %c0_63 = arith.constant 0 : index
    %c0_64 = arith.constant 0 : index
    %191 = vector.load %arg2[%c0_62, %c2, %c0_63, %c0_64] : memref<1x4x8x8xf32, #tpu.memory_space<vmem>>, vector<1x1x8x8xf32>
    %192 = vector.shape_cast %191 : vector<1x1x8x8xf32> to vector<8x8xf32>
    %cst_65 = arith.constant 0.353553385 : f32
    %193 = vector.broadcast %cst_65 : f32 to vector<8x8xf32>
    %194 = arith.mulf %192, %193 : vector<8x8xf32>
    %c0_66 = arith.constant 0 : index
    %c2_67 = arith.constant 2 : index
    %c0_68 = arith.constant 0 : index
    %c0_69 = arith.constant 0 : index
    %195 = vector.load %arg3[%c0_66, %c2_67, %c0_68, %c0_69] : memref<1x4x8x8xf32, #tpu.memory_space<vmem>>, vector<1x1x8x8xf32>
    %196 = vector.shape_cast %195 : vector<1x1x8x8xf32> to vector<8x8xf32>
    %cst_70 = arith.constant dense<0.000000e+00> : vector<8x8xf32>
    %197 = tpu.matmul %194, %196, %cst_70 {dimension_numbers = #tpu.dot_dimension_numbers<[1], [1], [0], [0], [0, 0, 1, 0], [], []>} : vector<8x8xf32>, vector<8x8xf32>, vector<8x8xf32> -> vector<8x8xf32>
    %c0_71 = arith.constant 0 : index
    %c2_72 = arith.constant 2 : index
    %c0_73 = arith.constant 0 : index
    %c0_74 = arith.constant 0 : index
    %198 = vector.load %arg5[%c0_71, %c2_72, %c0_73, %c0_74] : memref<1x4x8x9xf32, #tpu.memory_space<vmem>>, vector<1x1x8x9xf32>
    %199 = vector.shape_cast %198 : vector<1x1x8x9xf32> to vector<8x9xf32>
    %200 = vector.extract_strided_slice %199 {offsets = [0, 0], sizes = [8, 1], strides = [1, 1]} : vector<8x9xf32> to vector<8x1xf32>
    %cst_75 = arith.constant 0.000000e+00 : f32
    %201 = vector.shape_cast %200 : vector<8x1xf32> to vector<8x1xf32>
    %202 = vector.broadcast %201 : vector<8x1xf32> to vector<8x8xf32>
    %203 = vector.broadcast %cst_75 : f32 to vector<8x8xf32>
    %204 = arith.select %17, %202, %203 : vector<8x8xi1>, vector<8x8xf32>
    %205 = arith.addf %197, %204 : vector<8x8xf32>
    %206 = vector.extract_strided_slice %199 {offsets = [0, 1], sizes = [8, 1], strides = [1, 1]} : vector<8x9xf32> to vector<8x1xf32>
    %cst_76 = arith.constant 0.000000e+00 : f32
    %207 = vector.shape_cast %206 : vector<8x1xf32> to vector<8x1xf32>
    %208 = vector.broadcast %207 : vector<8x1xf32> to vector<8x8xf32>
    %209 = vector.broadcast %cst_76 : f32 to vector<8x8xf32>
    %210 = arith.select %19, %208, %209 : vector<8x8xi1>, vector<8x8xf32>
    %211 = arith.addf %205, %210 : vector<8x8xf32>
    %212 = vector.extract_strided_slice %199 {offsets = [0, 2], sizes = [8, 1], strides = [1, 1]} : vector<8x9xf32> to vector<8x1xf32>
    %cst_77 = arith.constant 0.000000e+00 : f32
    %213 = vector.shape_cast %212 : vector<8x1xf32> to vector<8x1xf32>
    %214 = vector.broadcast %213 : vector<8x1xf32> to vector<8x8xf32>
    %215 = vector.broadcast %cst_77 : f32 to vector<8x8xf32>
    %216 = arith.select %21, %214, %215 : vector<8x8xi1>, vector<8x8xf32>
    %217 = arith.addf %211, %216 : vector<8x8xf32>
    %218 = vector.extract_strided_slice %199 {offsets = [0, 3], sizes = [8, 1], strides = [1, 1]} : vector<8x9xf32> to vector<8x1xf32>
    %cst_78 = arith.constant 0.000000e+00 : f32
    %219 = vector.shape_cast %218 : vector<8x1xf32> to vector<8x1xf32>
    %220 = vector.broadcast %219 : vector<8x1xf32> to vector<8x8xf32>
    %221 = vector.broadcast %cst_78 : f32 to vector<8x8xf32>
    %222 = arith.select %23, %220, %221 : vector<8x8xi1>, vector<8x8xf32>
    %223 = arith.addf %217, %222 : vector<8x8xf32>
    %224 = vector.extract_strided_slice %199 {offsets = [0, 4], sizes = [8, 1], strides = [1, 1]} : vector<8x9xf32> to vector<8x1xf32>
    %cst_79 = arith.constant 0.000000e+00 : f32
    %225 = vector.shape_cast %224 : vector<8x1xf32> to vector<8x1xf32>
    %226 = vector.broadcast %225 : vector<8x1xf32> to vector<8x8xf32>
    %227 = vector.broadcast %cst_79 : f32 to vector<8x8xf32>
    %228 = arith.select %25, %226, %227 : vector<8x8xi1>, vector<8x8xf32>
    %229 = arith.addf %223, %228 : vector<8x8xf32>
    %230 = vector.extract_strided_slice %199 {offsets = [0, 5], sizes = [8, 1], strides = [1, 1]} : vector<8x9xf32> to vector<8x1xf32>
    %cst_80 = arith.constant 0.000000e+00 : f32
    %231 = vector.shape_cast %230 : vector<8x1xf32> to vector<8x1xf32>
    %232 = vector.broadcast %231 : vector<8x1xf32> to vector<8x8xf32>
    %233 = vector.broadcast %cst_80 : f32 to vector<8x8xf32>
    %234 = arith.select %27, %232, %233 : vector<8x8xi1>, vector<8x8xf32>
    %235 = arith.addf %229, %234 : vector<8x8xf32>
    %236 = vector.extract_strided_slice %199 {offsets = [0, 6], sizes = [8, 1], strides = [1, 1]} : vector<8x9xf32> to vector<8x1xf32>
    %cst_81 = arith.constant 0.000000e+00 : f32
    %237 = vector.shape_cast %236 : vector<8x1xf32> to vector<8x1xf32>
    %238 = vector.broadcast %237 : vector<8x1xf32> to vector<8x8xf32>
    %239 = vector.broadcast %cst_81 : f32 to vector<8x8xf32>
    %240 = arith.select %29, %238, %239 : vector<8x8xi1>, vector<8x8xf32>
    %241 = arith.addf %235, %240 : vector<8x8xf32>
    %242 = vector.extract_strided_slice %199 {offsets = [0, 7], sizes = [8, 1], strides = [1, 1]} : vector<8x9xf32> to vector<8x1xf32>
    %cst_82 = arith.constant 0.000000e+00 : f32
    %243 = vector.shape_cast %242 : vector<8x1xf32> to vector<8x1xf32>
    %244 = vector.broadcast %243 : vector<8x1xf32> to vector<8x8xf32>
    %245 = vector.broadcast %cst_82 : f32 to vector<8x8xf32>
    %246 = arith.select %31, %244, %245 : vector<8x8xi1>, vector<8x8xf32>
    %247 = arith.addf %241, %246 : vector<8x8xf32>
    %248 = vector.extract_strided_slice %199 {offsets = [0, 8], sizes = [8, 1], strides = [1, 1]} : vector<8x9xf32> to vector<8x1xf32>
    %cst_83 = arith.constant 0.000000e+00 : f32
    %249 = vector.shape_cast %248 : vector<8x1xf32> to vector<8x1xf32>
    %250 = vector.broadcast %249 : vector<8x1xf32> to vector<8x8xf32>
    %251 = vector.broadcast %cst_83 : f32 to vector<8x8xf32>
    %252 = arith.select %33, %250, %251 : vector<8x8xi1>, vector<8x8xf32>
    %253 = arith.addf %247, %252 : vector<8x8xf32>
    %cst_84 = arith.constant dense<0xFF800000> : vector<8xf32>
    %254 = vector.multi_reduction <maximumf>, %253, %cst_84 [1] : vector<8x8xf32> to vector<8xf32>
    %255 = vector.shape_cast %254 : vector<8xf32> to vector<8x1xf32>
    %256 = vector.broadcast %255 : vector<8x1xf32> to vector<8x8xf32>
    %257 = arith.subf %253, %256 : vector<8x8xf32>
    %258 = math.exp %257 : vector<8x8xf32>
    %cst_85 = arith.constant dense<0.000000e+00> : vector<8xf32>
    %259 = vector.multi_reduction <add>, %258, %cst_85 [1] : vector<8x8xf32> to vector<8xf32>
    %260 = vector.shape_cast %259 : vector<8xf32> to vector<8x1xf32>
    %261 = tpu.reciprocal %260 {approx = true} : vector<8x1xf32> -> vector<8x1xf32>
    %262 = vector.broadcast %261 : vector<8x1xf32> to vector<8x8xf32>
    %263 = arith.mulf %258, %262 : vector<8x8xf32>
    %264 = vector.extract_strided_slice %3 {offsets = [0, 16], sizes = [8, 8], strides = [1, 1]} : vector<8x32xf32> to vector<8x8xf32>
    %cst_86 = arith.constant dense<0.000000e+00> : vector<8x8xf32>
    %265 = tpu.matmul %263, %264, %cst_86 {dimension_numbers = #tpu.dot_dimension_numbers<[1], [0], [0], [1], [0, 0, 1, 1], [], []>} : vector<8x8xf32>, vector<8x8xf32>, vector<8x8xf32> -> vector<8x8xf32>
    %c16 = arith.constant 16 : index
    %c0_87 = arith.constant 0 : index
    %266 = vector.load %arg8[%c16, %c0_87] : memref<32x32xf32, #tpu.memory_space<vmem>>, vector<8x32xf32>
    %cst_88 = arith.constant dense<0.000000e+00> : vector<8x32xf32>
    %267 = tpu.matmul %265, %266, %cst_88 {dimension_numbers = #tpu.dot_dimension_numbers<[1], [0], [0], [1], [0, 0, 1, 1], [], []>} : vector<8x8xf32>, vector<8x32xf32>, vector<8x32xf32> -> vector<8x32xf32>
    %268 = arith.addf %190, %267 : vector<8x32xf32>
    %c0_89 = arith.constant 0 : index
    %c3 = arith.constant 3 : index
    %c0_90 = arith.constant 0 : index
    %c0_91 = arith.constant 0 : index
    %269 = vector.load %arg2[%c0_89, %c3, %c0_90, %c0_91] : memref<1x4x8x8xf32, #tpu.memory_space<vmem>>, vector<1x1x8x8xf32>
    %270 = vector.shape_cast %269 : vector<1x1x8x8xf32> to vector<8x8xf32>
    %cst_92 = arith.constant 0.353553385 : f32
    %271 = vector.broadcast %cst_92 : f32 to vector<8x8xf32>
    %272 = arith.mulf %270, %271 : vector<8x8xf32>
    %c0_93 = arith.constant 0 : index
    %c3_94 = arith.constant 3 : index
    %c0_95 = arith.constant 0 : index
    %c0_96 = arith.constant 0 : index
    %273 = vector.load %arg3[%c0_93, %c3_94, %c0_95, %c0_96] : memref<1x4x8x8xf32, #tpu.memory_space<vmem>>, vector<1x1x8x8xf32>
    %274 = vector.shape_cast %273 : vector<1x1x8x8xf32> to vector<8x8xf32>
    %cst_97 = arith.constant dense<0.000000e+00> : vector<8x8xf32>
    %275 = tpu.matmul %272, %274, %cst_97 {dimension_numbers = #tpu.dot_dimension_numbers<[1], [1], [0], [0], [0, 0, 1, 0], [], []>} : vector<8x8xf32>, vector<8x8xf32>, vector<8x8xf32> -> vector<8x8xf32>
    %c0_98 = arith.constant 0 : index
    %c3_99 = arith.constant 3 : index
    %c0_100 = arith.constant 0 : index
    %c0_101 = arith.constant 0 : index
    %276 = vector.load %arg5[%c0_98, %c3_99, %c0_100, %c0_101] : memref<1x4x8x9xf32, #tpu.memory_space<vmem>>, vector<1x1x8x9xf32>
    %277 = vector.shape_cast %276 : vector<1x1x8x9xf32> to vector<8x9xf32>
    %278 = vector.extract_strided_slice %277 {offsets = [0, 0], sizes = [8, 1], strides = [1, 1]} : vector<8x9xf32> to vector<8x1xf32>
    %cst_102 = arith.constant 0.000000e+00 : f32
    %279 = vector.shape_cast %278 : vector<8x1xf32> to vector<8x1xf32>
    %280 = vector.broadcast %279 : vector<8x1xf32> to vector<8x8xf32>
    %281 = vector.broadcast %cst_102 : f32 to vector<8x8xf32>
    %282 = arith.select %17, %280, %281 : vector<8x8xi1>, vector<8x8xf32>
    %283 = arith.addf %275, %282 : vector<8x8xf32>
    %284 = vector.extract_strided_slice %277 {offsets = [0, 1], sizes = [8, 1], strides = [1, 1]} : vector<8x9xf32> to vector<8x1xf32>
    %cst_103 = arith.constant 0.000000e+00 : f32
    %285 = vector.shape_cast %284 : vector<8x1xf32> to vector<8x1xf32>
    %286 = vector.broadcast %285 : vector<8x1xf32> to vector<8x8xf32>
    %287 = vector.broadcast %cst_103 : f32 to vector<8x8xf32>
    %288 = arith.select %19, %286, %287 : vector<8x8xi1>, vector<8x8xf32>
    %289 = arith.addf %283, %288 : vector<8x8xf32>
    %290 = vector.extract_strided_slice %277 {offsets = [0, 2], sizes = [8, 1], strides = [1, 1]} : vector<8x9xf32> to vector<8x1xf32>
    %cst_104 = arith.constant 0.000000e+00 : f32
    %291 = vector.shape_cast %290 : vector<8x1xf32> to vector<8x1xf32>
    %292 = vector.broadcast %291 : vector<8x1xf32> to vector<8x8xf32>
    %293 = vector.broadcast %cst_104 : f32 to vector<8x8xf32>
    %294 = arith.select %21, %292, %293 : vector<8x8xi1>, vector<8x8xf32>
    %295 = arith.addf %289, %294 : vector<8x8xf32>
    %296 = vector.extract_strided_slice %277 {offsets = [0, 3], sizes = [8, 1], strides = [1, 1]} : vector<8x9xf32> to vector<8x1xf32>
    %cst_105 = arith.constant 0.000000e+00 : f32
    %297 = vector.shape_cast %296 : vector<8x1xf32> to vector<8x1xf32>
    %298 = vector.broadcast %297 : vector<8x1xf32> to vector<8x8xf32>
    %299 = vector.broadcast %cst_105 : f32 to vector<8x8xf32>
    %300 = arith.select %23, %298, %299 : vector<8x8xi1>, vector<8x8xf32>
    %301 = arith.addf %295, %300 : vector<8x8xf32>
    %302 = vector.extract_strided_slice %277 {offsets = [0, 4], sizes = [8, 1], strides = [1, 1]} : vector<8x9xf32> to vector<8x1xf32>
    %cst_106 = arith.constant 0.000000e+00 : f32
    %303 = vector.shape_cast %302 : vector<8x1xf32> to vector<8x1xf32>
    %304 = vector.broadcast %303 : vector<8x1xf32> to vector<8x8xf32>
    %305 = vector.broadcast %cst_106 : f32 to vector<8x8xf32>
    %306 = arith.select %25, %304, %305 : vector<8x8xi1>, vector<8x8xf32>
    %307 = arith.addf %301, %306 : vector<8x8xf32>
    %308 = vector.extract_strided_slice %277 {offsets = [0, 5], sizes = [8, 1], strides = [1, 1]} : vector<8x9xf32> to vector<8x1xf32>
    %cst_107 = arith.constant 0.000000e+00 : f32
    %309 = vector.shape_cast %308 : vector<8x1xf32> to vector<8x1xf32>
    %310 = vector.broadcast %309 : vector<8x1xf32> to vector<8x8xf32>
    %311 = vector.broadcast %cst_107 : f32 to vector<8x8xf32>
    %312 = arith.select %27, %310, %311 : vector<8x8xi1>, vector<8x8xf32>
    %313 = arith.addf %307, %312 : vector<8x8xf32>
    %314 = vector.extract_strided_slice %277 {offsets = [0, 6], sizes = [8, 1], strides = [1, 1]} : vector<8x9xf32> to vector<8x1xf32>
    %cst_108 = arith.constant 0.000000e+00 : f32
    %315 = vector.shape_cast %314 : vector<8x1xf32> to vector<8x1xf32>
    %316 = vector.broadcast %315 : vector<8x1xf32> to vector<8x8xf32>
    %317 = vector.broadcast %cst_108 : f32 to vector<8x8xf32>
    %318 = arith.select %29, %316, %317 : vector<8x8xi1>, vector<8x8xf32>
    %319 = arith.addf %313, %318 : vector<8x8xf32>
    %320 = vector.extract_strided_slice %277 {offsets = [0, 7], sizes = [8, 1], strides = [1, 1]} : vector<8x9xf32> to vector<8x1xf32>
    %cst_109 = arith.constant 0.000000e+00 : f32
    %321 = vector.shape_cast %320 : vector<8x1xf32> to vector<8x1xf32>
    %322 = vector.broadcast %321 : vector<8x1xf32> to vector<8x8xf32>
    %323 = vector.broadcast %cst_109 : f32 to vector<8x8xf32>
    %324 = arith.select %31, %322, %323 : vector<8x8xi1>, vector<8x8xf32>
    %325 = arith.addf %319, %324 : vector<8x8xf32>
    %326 = vector.extract_strided_slice %277 {offsets = [0, 8], sizes = [8, 1], strides = [1, 1]} : vector<8x9xf32> to vector<8x1xf32>
    %cst_110 = arith.constant 0.000000e+00 : f32
    %327 = vector.shape_cast %326 : vector<8x1xf32> to vector<8x1xf32>
    %328 = vector.broadcast %327 : vector<8x1xf32> to vector<8x8xf32>
    %329 = vector.broadcast %cst_110 : f32 to vector<8x8xf32>
    %330 = arith.select %33, %328, %329 : vector<8x8xi1>, vector<8x8xf32>
    %331 = arith.addf %325, %330 : vector<8x8xf32>
    %cst_111 = arith.constant dense<0xFF800000> : vector<8xf32>
    %332 = vector.multi_reduction <maximumf>, %331, %cst_111 [1] : vector<8x8xf32> to vector<8xf32>
    %333 = vector.shape_cast %332 : vector<8xf32> to vector<8x1xf32>
    %334 = vector.broadcast %333 : vector<8x1xf32> to vector<8x8xf32>
    %335 = arith.subf %331, %334 : vector<8x8xf32>
    %336 = math.exp %335 : vector<8x8xf32>
    %cst_112 = arith.constant dense<0.000000e+00> : vector<8xf32>
    %337 = vector.multi_reduction <add>, %336, %cst_112 [1] : vector<8x8xf32> to vector<8xf32>
    %338 = vector.shape_cast %337 : vector<8xf32> to vector<8x1xf32>
    %339 = tpu.reciprocal %338 {approx = true} : vector<8x1xf32> -> vector<8x1xf32>
    %340 = vector.broadcast %339 : vector<8x1xf32> to vector<8x8xf32>
    %341 = arith.mulf %336, %340 : vector<8x8xf32>
    %342 = vector.extract_strided_slice %3 {offsets = [0, 24], sizes = [8, 8], strides = [1, 1]} : vector<8x32xf32> to vector<8x8xf32>
    %cst_113 = arith.constant dense<0.000000e+00> : vector<8x8xf32>
    %343 = tpu.matmul %341, %342, %cst_113 {dimension_numbers = #tpu.dot_dimension_numbers<[1], [0], [0], [1], [0, 0, 1, 1], [], []>} : vector<8x8xf32>, vector<8x8xf32>, vector<8x8xf32> -> vector<8x8xf32>
    %c24 = arith.constant 24 : index
    %c0_114 = arith.constant 0 : index
    %344 = vector.load %arg8[%c24, %c0_114] : memref<32x32xf32, #tpu.memory_space<vmem>>, vector<8x32xf32>
    %cst_115 = arith.constant dense<0.000000e+00> : vector<8x32xf32>
    %345 = tpu.matmul %343, %344, %cst_115 {dimension_numbers = #tpu.dot_dimension_numbers<[1], [0], [0], [1], [0, 0, 1, 1], [], []>} : vector<8x8xf32>, vector<8x32xf32>, vector<8x32xf32> -> vector<8x32xf32>
    %346 = arith.addf %268, %345 : vector<8x32xf32>
    %c0_116 = arith.constant 0 : index
    %c0_117 = arith.constant 0 : index
    %c0_118 = arith.constant 0 : index
    %347 = vector.load %arg9[%c0_116, %c0_117, %c0_118] : memref<1x8x32xf32, #tpu.memory_space<vmem>>, vector<1x8x32xf32>
    %348 = vector.shape_cast %347 : vector<1x8x32xf32> to vector<8x32xf32>
    %349 = vector.shape_cast %346 : vector<8x32xf32> to vector<1x8x32xf32>
    tpu.vector_store %arg9[%c0_116, %c0_117, %c0_118], %349 {strides = array<i32>} : memref<1x8x32xf32, #tpu.memory_space<vmem>>, vector<1x8x32xf32>,
    return
  }
  func.func @transform_0(%arg0: i32, %arg1: i32) -> (i32, i32, i32, i32) {
    %c0_i32 = arith.constant 0 : i32
    %c0_i32_0 = arith.constant 0 : i32
    %c0_i32_1 = arith.constant 0 : i32
    return %arg0, %c0_i32, %arg1, %c0_i32_0 : i32, i32, i32, i32
  }
  func.func @transform_1(%arg0: i32, %arg1: i32) -> (i32, i32, i32, i32) {
    %c0_i32 = arith.constant 0 : i32
    %c0_i32_0 = arith.constant 0 : i32
    %c0_i32_1 = arith.constant 0 : i32
    %c0_i32_2 = arith.constant 0 : i32
    return %arg0, %c0_i32, %c0_i32_0, %c0_i32_1 : i32, i32, i32, i32
  }
  func.func @transform_2(%arg0: i32, %arg1: i32) -> (i32, i32, i32) {
    %c0_i32 = arith.constant 0 : i32
    %c0_i32_0 = arith.constant 0 : i32
    %c0_i32_1 = arith.constant 0 : i32
    return %arg0, %c0_i32, %c0_i32_0 : i32, i32, i32
  }
  func.func @transform_3(%arg0: i32, %arg1: i32) -> (i32, i32, i32, i32) {
    %c0_i32 = arith.constant 0 : i32
    %c0_i32_0 = arith.constant 0 : i32
    %c0_i32_1 = arith.constant 0 : i32
    return %arg0, %c0_i32, %arg1, %c0_i32_0 : i32, i32, i32, i32
  }
  func.func @transform_4(%arg0: i32, %arg1: i32) -> (i32, i32) {
    %c0_i32 = arith.constant 0 : i32
    %c0_i32_0 = arith.constant 0 : i32
    %c0_i32_1 = arith.constant 0 : i32
    return %c0_i32, %c0_i32_0 : i32, i32
  }
  func.func @transform_5(%arg0: i32, %arg1: i32) -> (i32, i32) {
    %c0_i32 = arith.constant 0 : i32
    %c0_i32_0 = arith.constant 0 : i32
    %c0_i32_1 = arith.constant 0 : i32
    return %c0_i32, %c0_i32_0 : i32, i32
  }
  func.func @transform_6(%arg0: i32, %arg1: i32) -> (i32, i32) {
    %c0_i32 = arith.constant 0 : i32
    %c0_i32_0 = arith.constant 0 : i32
    %c0_i32_1 = arith.constant 0 : i32
    return %c0_i32, %c0_i32_0 : i32, i32
  }
  func.func @transform_7(%arg0: i32, %arg1: i32) -> (i32, i32, i32) {
    %c0_i32 = arith.constant 0 : i32
    %c0_i32_0 = arith.constant 0 : i32
    return %arg0, %arg1, %c0_i32 : i32, i32, i32
  }
}

</mosaic_0001>

<bundles_post_ra>
// kernel: tpu_custom_call.1
= control target key start
LH: loop header
LB: loop body
LE: loop exit
PB: predicated region body
PF: predicated region fallthrough
CT: control target
= control target key end

     0   :  { %s3057_s0 = inlined_call_operand.hbm [shape: f32[2,4,8,8], index: 0, kind: input, shape index: {}]   ;;  %s3058_s1 = inlined_call_operand.hbm [shape: f32[2,4,8,8], index: 1, kind: input, shape index: {}]   ;;  %s3059_s2 = inlined_call_operand.hbm [shape: f32[2,8,32], index: 2, kind: input, shape index: {}]   ;;  %s3060_s3 = inlined_call_operand.hbm [shape: f32[2,4,8,9], index: 3, kind: input, shape index: {}]   ;;  %s3061_s4 = inlined_call_operand.vmem [shape: f32[1,32], index: 4, kind: input, shape index: {}]   ;;  %s3062_s5 = inlined_call_operand.vmem [shape: f32[1,32], index: 5, kind: input, shape index: {}]   ;;  %s3063_s6 = inlined_call_operand.hbm [shape: f32[32,32], index: 6, kind: input, shape index: {}]   ;;  %s3064_s7 = inlined_call_operand.hbm [shape: f32[2,8,32], index: 7, kind: output, shape index: {}]  }
   0x1   :  { %3083 = sst [smem:[#allocation25_spill]] %s3057_s0 }
   0x2   :  { %3084 = sst [smem:[#allocation26_spill]] %s3058_s1 }
   0x3   :  { %3085 = sst [smem:[#allocation27_spill]] %s3061_s4 }
   0x4   :  { %3086 = sst [smem:[#allocation28_spill]] %s3062_s5 }
   0x5   :  { %3087 = sst [smem:[#allocation29_spill]] %s3063_s6 }
   0x6   :  { %3088 = sst [smem:[#allocation30_spill]] %s3064_s7 }
   0x7   :  { %12 = vsyncpa [#allocation4], 0 }
   0x8   :  { %14 = vsyncpa [#allocation4 + $0x1], 0 }
   0x9   :  { %15 = vsyncpa [#allocation7], 0 }
   0xa   :  { %17 = vsyncpa [#allocation7 + $0x1], 0 }
   0xb   :  { %18 = vsyncpa [#allocation10], 0 }
   0xc   :  { %20 = vsyncpa [#allocation10 + $0x1], 0 }
   0xd   :  { %21 = vsyncpa [#allocation5], 0 }
   0xe   :  { %23 = vsyncpa [#allocation5 + $0x1], 0  ;;  %s2481_s24 = smov 0   ;;  %s2483_s25 = smov 0  }
   0xf   :  { %s2485_s26 = smov 0   ;;  %s2487_s27 = smov 0  }
  0x10   :  { %s2489_s28 = smov 0   ;;  %s2491_s29 = smov 0  }
  0x11 LB: > { %3089 = sst [smem:[#allocation18_spill]] %s2397_s24  ;;  %s2512_s30 = sadd.s32 4294967295, %s2417_s29   ;;  %s2417_s29 = sphi %s2491_s29, %s29_s29   ;;  %s2413_s28 = sphi %s2489_s28, %s3136_s28   ;;  %s2409_s27 = sphi %s2487_s27, %s3135_s27   ;;  %s2405_s26 = sphi %s2485_s26, %s3131_s26   ;;  %s2401_s25 = sphi %s2483_s25, %s3134_s25   ;;  %s2397_s24 = sphi %s2481_s24, %s3133_s24  }
  0x12   : > { %3090 = sst [smem:[#allocation19_spill]] %s2405_s26  ;;  %s1871_s8 = sadd.s32 4294967294, %s2417_s29  }
  0x13   : > { %3091 = sst [smem:[#allocation20_spill]] %s2409_s27  ;;  %p57_p0 = scmp.ne.s32.totalorder %s2405_s26, %s2401_s25 }
  0x14   : > { %p58_p1 = scmp.eq.s32.totalorder %s2417_s29, 0  ;;  %p63_p2 = scmp.ne.s32.totalorder %s2401_s25, %s2397_s24 }
  0x15   : > { %p3066_p3 = scmp.eq.s32.totalorder %s2512_s30, 0  ;;  %p232_p4 = scmp.eq.s32.totalorder %s2512_s30, 1 }
  0x16   : > { %p2523_p5 = por %p58_p1, %p57_p0  ;;  %p238_p6 = scmp.eq.s32.totalorder %s1871_s8, 1 }
  0x17   : > { %p2529_p7 = por %p3066_p3, %p63_p2  ;;  %p2533_p8 = por %p232_p4, %p57_p0 }
  0x18   : > { %s3092_s10 = scalar_select %p2523_p5, 1, 0 }
  0x19   : > { %s3093_s11 = scalar_select %p2529_p7, 1, 0 }
  0x1a   : > { %s3094_s12 = scalar_select %p2533_p8, 1, 0 }
  0x1b   : > { %p2537_p9 = por %p238_p6, %p63_p2  ;;  %p1872_p10 = scmp.ge.s32.totalorder %s2417_s29, 1 }
  0x1c   : > { %3095 = sst [smem:[#allocation21_spill]] %s3094_s12  ;;  %p245_p11 = scmp.lt.s32.totalorder %s2417_s29, 3 }
  0x1d   : > { %s3096_s13 = scalar_select %p2537_p9, 1, 0 }
  0x1e   : > { %p2543_p12 = pnand %p1872_p10, %p245_p11  ;;  %s2419_s15 = smov [#allocation11]  }
  0x1f   : > { %3097 = sst [smem:[#allocation22_spill]] %s3096_s13  ;;  %s263_s16 = sshll.u32 %s2419_s15, 4  ;;  %s2547_s16 = int_to_ptr.vmem [resolvable:$true] %s263_s16 }
  0x20   : > { %s3098_s14 = scalar_select %p2543_p12, 1, 0 }
  0x21   : > { %p2031_p13 = pneg %p2543_p12  ;;  %s41_s18 = sadd.s32 1, %s2413_s28 }
  0x22   : > { %s2561_s19 = sand.u32 1, %s2405_s26   ;;  %p2563_p4 = scmp.ge.s32.totalorder %s41_s18, 2 }
  0x23   : > { %p2555_p2 = pnand %p2031_p13, %p3066_p3  ;;  %s3101_s6 = sld [smem:[#allocation29_spill]] }
  0x24   : > { %s3100_s20 = scalar_select %p2563_p4, 1, 0 }
  0x25   : > { %p2177_p10 = pneg %p2555_p2 }
  0x29   : > { %s2175_s23 = scalar_lea.hbm %s3101_s6, 512 }
  0x2a   : > { %p2176_p6 = scmp.ne.s32.totalorder %s3101_s6, %s2175_s23  ;;  %p2182_p0 = scmp.lt.u32.totalorder %s2175_s23, %s3101_s6 }
  0x2c   : > { %p2178_p11 = pnand %p2177_p10, %p2176_p6 }
  0x2e   : > { %p2179_p13 = pneg %p2178_p11 }
  0x30   : > { %p2184_p3 = pnand %p2182_p0, %p2179_p13 }
  0x32   : > { %2187 = shalt.err (!%p2184_p3)
}
  0x33   : > { %s2188_s24 = scalar_lea.vmem %s2547_s16, 512  ;;  %p2196_p7 = scmp.lt.s32.totalorder %s2547_s16, %s2547_s16 }
  0x34   : > { %p2189_p1 = scmp.ne.s32.totalorder %s2547_s16, %s2188_s24  ;;  %p2197_p12 = scmp.lt.s32.totalorder %s2188_s24, %s2188_s24 }
  0x36   : > { %p2191_p9 = pnand %p2189_p1, %p2177_p10  ;;  %p2198_p5 = por %p2197_p12, %p2196_p7 }
  0x38   : > { %p2192_p8 = pneg %p2191_p9 }
  0x3a   : > { %p2199_p4 = pnand %p2198_p5, %p2192_p8 }
  0x3c   : > { %2202 = shalt.err (!%p2199_p4)
}
  0x3d   : > { %s3071_s21 = smov 128   ;;  %s3073_s9 = smov 8  }
  0x3e   : > { %2034 = dma.hbm_to_vmem [thread:$0]  (!%p2555_p2), %s3101_s6, 512, %s2547_s16, [#allocation10], %s3071_s21, %s3071_s21, %s3073_s9  }
  0x3f   : > { %p3102_p3 = scmp.ne.s32.totalorder %s3100_s20, 0  ;;  %s2596_s22 = sshll.u32 %s2561_s19, 5 }
  0x40   : > { %s2599_s23 = sshll.u32 %s2413_s28, 9  ;;  %p3104_p5 = scmp.ne.s32.totalorder %s3092_s10, 0 }
  0x41   : > { %s3138_s18 = smov (%p3102_p3, %s41_s18), 0  ;;  %p3105_p7 = scmp.lt.s32.totalorder %s2417_s29, 2 }
  0x42   : > { %3103 = sst [smem:[#allocation23_spill]] %s3138_s18  ;;  %s45_s8 = ssub.s32 %s2413_s28, %s3138_s18 }
  0x43   : > { %p2607_p8 = pnand %p3105_p7, %p3104_p5  ;;  %p48_p9 = scmp.eq.s32.totalorder %s45_s8, 0 }
  0x44   : > { %s3076_s16 = sand.u32 1, %s2417_s29   ;;  %s3107_s20 = sadd.s32 1, %s2405_s26 }
  0x45   : > { %s3106_s17 = scalar_select %p2607_p8, 1, 0 }
  0x46   : > { %s2615_s15 = scalar_select %p48_p9, %s2405_s26, %s3107_s20  }
  0x47   : > { %s3109_s1 = sld [smem:[#allocation26_spill]]  ;;  %s303_s10 = scalar_lea.vmem [#allocation6], %s2596_s22 }
  0x48   : > { %3108 = sst [smem:[#allocation24_spill]] %s2615_s15  ;;  %s310_s9 = sshll.u32 %s303_s10, 4  ;;  %s2624_s9 = int_to_ptr.vmem [resolvable:$true] %s310_s9 }
  0x49   : > { %s2628_s6 = scalar_lea.sflag [#allocation7], %s3076_s16  ;;  %p2634_p0 = pneg %p2607_p8 }
  0x4d   : > { %s2621_s21 = scalar_lea.hbm %s3109_s1, %s2599_s23  ;;  %s2208_s10 = scalar_lea.hbm %s3109_s1, 1024 }
  0x4e   : > { %s2203_s8 = scalar_lea.hbm %s2621_s21, 512  ;;  %p2209_p4 = scmp.lt.u32.totalorder %s2621_s21, %s3109_s1 }
  0x4f   : > { %p2204_p12 = scmp.ne.s32.totalorder %s2621_s21, %s2203_s8  ;;  %p2210_p6 = scmp.lt.u32.totalorder %s2208_s10, %s2203_s8 }
  0x50   : > { %p2212_p11 = scmp.lt.u32.totalorder %s2203_s8, %s2621_s21 }
  0x51   : > { %p2206_p1 = pnand %p2634_p0, %p2204_p12  ;;  %p2211_p10 = por %p2210_p6, %p2209_p4 }
  0x53   : > { %p2207_p2 = pneg %p2206_p1  ;;  %p2213_p13 = por %p2212_p11, %p2211_p10 }
  0x55   : > { %p2214_p3 = pnand %p2213_p13, %p2207_p2 }
  0x57   : > { %2217 = shalt.err (!%p2214_p3)
}
  0x58   : > { %s2218_s16 = scalar_lea.vmem %s2624_s9, 512  ;;  %s2422_s24 = smov [#allocation6]  }
  0x59   : > { %p2219_p5 = scmp.ne.s32.totalorder %s2624_s9, %s2218_s16  ;;  %s2223_s13 = sshll.u32 %s2422_s24, 4  ;;  %s2224_s13 = int_to_ptr.vmem [resolvable:$false] %s2223_s13 }
  0x5a   : > { %s2225_s18 = scalar_lea.vmem %s2224_s13, 1024  ;;  %p2226_p12 = scmp.lt.s32.totalorder %s2624_s9, %s2224_s13 }
  0x5b   : > { %p2221_p7 = pnand %p2219_p5, %p2634_p0  ;;  %p2227_p1 = scmp.lt.s32.totalorder %s2225_s18, %s2218_s16 }
  0x5d   : > { %p2222_p9 = pneg %p2221_p7  ;;  %p2228_p4 = por %p2227_p1, %p2226_p12 }
  0x5f   : > { %p2229_p6 = pnand %p2228_p4, %p2222_p9 }
  0x61   : > { %2232 = shalt.err (!%p2229_p6)
}
  0x62   : > { %s3111_s15 = smov 8   ;;  %s3112_s8 = smov 128  }
  0x63   : > { %2041 = dma.hbm_to_vmem [thread:$0]  (!%p2607_p8), %s2621_s21, 512, %s2624_s9, %s2628_s6, %s3112_s8, %s3112_s8, %s3111_s15  }
  0x64   : > { %s3113_s0 = sld [smem:[#allocation25_spill]]  ;;  %s281_s13 = scalar_lea.vmem [#allocation3], %s2596_s22 }
  0x65   : > { %s289_s18 = sshll.u32 %s281_s13, 4  ;;  %s1881_s1 = sshll.u32 %s2561_s19, 3  ;;  %s2669_s18 = int_to_ptr.vmem [resolvable:$true] %s289_s18 }
  0x66   : > { %s278_s26 = scalar_lea.sflag [#allocation4], %s2561_s19 }
  0x6a   : > { %s2665_s16 = scalar_lea.hbm %s3113_s0, %s2599_s23  ;;  %s2238_s10 = scalar_lea.hbm %s3113_s0, 1024 }
  0x6b   : > { %s2233_s7 = scalar_lea.hbm %s2665_s16, 512  ;;  %p2239_p13 = scmp.lt.u32.totalorder %s2665_s16, %s3113_s0 }
  0x6c   : > { %p2234_p2 = scmp.ne.s32.totalorder %s2665_s16, %s2233_s7  ;;  %p2240_p3 = scmp.lt.u32.totalorder %s2238_s10, %s2233_s7 }
  0x6d   : > { %p2242_p7 = scmp.lt.u32.totalorder %s2233_s7, %s2665_s16 }
  0x6e   : > { %p2236_p10 = pnand %p2234_p2, %p2634_p0  ;;  %p2241_p5 = por %p2240_p3, %p2239_p13 }
  0x70   : > { %p2237_p11 = pneg %p2236_p10  ;;  %p2243_p9 = por %p2242_p7, %p2241_p5 }
  0x72   : > { %p2244_p12 = pnand %p2243_p9, %p2237_p11 }
  0x74   : > { %2247 = shalt.err (!%p2244_p12)
}
  0x75   : > { %s2248_s13 = scalar_lea.vmem %s2669_s18, 512  ;;  %s2423_s21 = smov [#allocation3]  }
  0x76   : > { %p2249_p1 = scmp.ne.s32.totalorder %s2669_s18, %s2248_s13  ;;  %s2253_s9 = sshll.u32 %s2423_s21, 4  ;;  %s2254_s9 = int_to_ptr.vmem [resolvable:$false] %s2253_s9 }
  0x77   : > { %s2255_s12 = scalar_lea.vmem %s2254_s9, 1024  ;;  %p2256_p2 = scmp.lt.s32.totalorder %s2669_s18, %s2254_s9 }
  0x78   : > { %p2251_p4 = pnand %p2249_p1, %p2634_p0  ;;  %p2257_p10 = scmp.lt.s32.totalorder %s2255_s12, %s2248_s13 }
  0x7a   : > { %p2252_p6 = pneg %p2251_p4  ;;  %p2258_p13 = por %p2257_p10, %p2256_p2 }
  0x7c   : > { %p2259_p3 = pnand %p2258_p13, %p2252_p6 }
  0x7e   : > { %2262 = shalt.err (!%p2259_p3)
}
  0x7f   : > { %2038 = dma.hbm_to_vmem [thread:$0]  (!%p2607_p8), %s2665_s16, 512, %s2669_s18, %s278_s26, %s3112_s8, %s3112_s8, %s3111_s15  }
  0x80   : > { %s1882_s7 = sshll.u32 %s2413_s28, 7  ;;  %s324_s10 = scalar_lea.vmem [#allocation8], %s1881_s1 }
  0x81   : > { %s331_s24 = sshll.u32 %s324_s10, 4  ;;  %s329_s9 = scalar_lea.hbm %s3059_s2, %s1882_s7  ;;  %s332_s24 = int_to_ptr.vmem [resolvable:$true] %s331_s24 }
  0x82   : > { %s2263_s12 = scalar_lea.hbm %s329_s9, 128  ;;  %s2268_s5 = scalar_lea.hbm %s3059_s2, 256 }
  0x83   : > { %p2264_p11 = scmp.ne.s32.totalorder %s329_s9, %s2263_s12  ;;  %p2269_p9 = scmp.lt.u32.totalorder %s329_s9, %s3059_s2 }
  0x84   : > { %p2270_p12 = scmp.lt.u32.totalorder %s2268_s5, %s2263_s12  ;;  %p2272_p4 = scmp.lt.u32.totalorder %s2263_s12, %s329_s9 }
  0x85   : > { %p2266_p5 = pnand %p2264_p11, %p2634_p0 }
  0x86   : > { %p2271_p1 = por %p2270_p12, %p2269_p9 }
  0x87   : > { %p2267_p7 = pneg %p2266_p5 }
  0x88   : > { %p2273_p6 = por %p2272_p4, %p2271_p1 }
  0x8a   : > { %p2274_p2 = pnand %p2273_p6, %p2267_p7 }
  0x8c   : > { %2277 = shalt.err (!%p2274_p2)
}
  0x8d   : > { %s2278_s1 = scalar_lea.vmem %s332_s24, 128  ;;  %s2424_s19 = smov [#allocation8]  }
  0x8e   : > { %p2279_p10 = scmp.ne.s32.totalorder %s332_s24, %s2278_s1  ;;  %s2283_s16 = sshll.u32 %s2424_s19, 4  ;;  %s2284_s16 = int_to_ptr.vmem [resolvable:$false] %s2283_s16 }
  0x8f   : > { %s2285_s0 = scalar_lea.vmem %s2284_s16, 256  ;;  %p2286_p11 = scmp.lt.s32.totalorder %s332_s24, %s2284_s16 }
  0x90   : > { %p2281_p13 = pnand %p2279_p10, %p2634_p0  ;;  %p2287_p5 = scmp.lt.s32.totalorder %s2285_s0, %s2278_s1 }
  0x92   : > { %p2282_p3 = pneg %p2281_p13  ;;  %p2288_p8 = por %p2287_p5, %p2286_p11 }
  0x94   : > { %p2289_p9 = pnand %p2288_p8, %p2282_p3 }
  0x96   : > { %2292 = shalt.err (!%p2289_p9)
}
  0x97   : > { %p3114_p12 = scmp.ne.s32.totalorder %s3106_s17, 0  ;;  %s2721_s27 = scalar_lea.hbm %s3060_s3, %s2599_s23 }
  0x98   : > { %s342_s18 = scalar_lea.vmem [#allocation9], %s2596_s22  ;;  %s3115_s10 = sand.u32 1, %s2417_s29  }
  0x99   : > { %2044 = dma.hbm_to_vmem [thread:$0]  (!%p3114_p12), %s329_s9, 128, %s332_s24, %s2628_s6  }
  0x9a   : > { %s350_s7 = sshll.u32 %s342_s18, 4  ;;  %s2728_s13 = scalar_lea.sflag [#allocation10], %s3115_s10  ;;  %s2724_s7 = int_to_ptr.vmem [resolvable:$true] %s350_s7 }
  0x9b   : > { %s2293_s21 = scalar_lea.hbm %s2721_s27, 512  ;;  %s2298_s23 = scalar_lea.hbm %s3060_s3, 1024 }
  0x9c   : > { %p2294_p8 = scmp.ne.s32.totalorder %s2721_s27, %s2293_s21  ;;  %p2299_p4 = scmp.lt.u32.totalorder %s2721_s27, %s3060_s3 }
  0x9d   : > { %p2300_p6 = scmp.lt.u32.totalorder %s2298_s23, %s2293_s21  ;;  %p2302_p10 = scmp.lt.u32.totalorder %s2293_s21, %s2721_s27 }
  0x9e   : > { %p2296_p7 = pnand %p2294_p8, %p2634_p0 }
  0x9f   : > { %p2301_p2 = por %p2300_p6, %p2299_p4 }
  0xa0   : > { %p2297_p1 = pneg %p2296_p7 }
  0xa1   : > { %p2303_p13 = por %p2302_p10, %p2301_p2 }
  0xa3   : > { %p2304_p3 = pnand %p2303_p13, %p2297_p1 }
  0xa5   : > { %2307 = shalt.err (!%p2304_p3)
}
  0xa6   : > { %s2308_s22 = scalar_lea.vmem %s2724_s7, 512  ;;  %s2425_s26 = smov [#allocation9]  }
  0xa7   : > { %p2309_p11 = scmp.ne.s32.totalorder %s2724_s7, %s2308_s22  ;;  %s2313_s1 = sshll.u32 %s2425_s26, 4  ;;  %s2314_s1 = int_to_ptr.vmem [resolvable:$false] %s2313_s1 }
  0xa8   : > { %s2315_s19 = scalar_lea.vmem %s2314_s1, 1024  ;;  %p2316_p8 = scmp.lt.s32.totalorder %s2724_s7, %s2314_s1 }
  0xa9   : > { %p2311_p5 = pnand %p2309_p11, %p2634_p0  ;;  %p2317_p7 = scmp.lt.s32.totalorder %s2315_s19, %s2308_s22 }
  0xab   : > { %p2312_p9 = pneg %p2311_p5  ;;  %p2318_p4 = por %p2317_p7, %p2316_p8 }
  0xad   : > { %p2319_p6 = pnand %p2318_p4, %p2312_p9 }
  0xaf   : > { %2322 = shalt.err (!%p2319_p6)
}
  0xb0   : > { %2047 = dma.hbm_to_vmem [thread:$0]  (!%p3114_p12), %s2721_s27, 512, %s2724_s7, %s2728_s13, %s3112_s8, %s3112_s8, %s3111_s15  }
  0xb1   : > { %p3116_p0 = scmp.ne.s32.totalorder %s3098_s14, 0 }
  0xb2   : > { %s2758_s20 = sand.u32 (!%p3116_p0), 1, %s2401_s25   ;;  %p3117_p1 = scmp.ne.s32.totalorder (!%p3116_p0), %s3093_s11, 0 }
  0xb3   : > { %362 = sbr.rel (%p3116_p0) target bundleno = 2288 (0x8f0), region = 48  ;;  %s1887_s16 = sshll.u32 (!%p3116_p0), %s2758_s20, 5 }
  0xb4   : > { %s365_s0 = scalar_lea.sflag (!%p3116_p0), [#allocation4], %s2758_s20  ;;  %s2762_s4 = scalar_lea.vmem (!%p3116_p0), [#allocation3], %s1887_s16 }
  0xba   : > { %2376 = dma.done.wait (%p3117_p1), %s365_s0, 512  }
  0xbb   : > { %2378 = vsyncadd (%p3117_p1), %s365_s0, 4294966784  ;;  %s373_s17 = sand.u32 1, %s2512_s30   ;;  %s2769_s15 = scalar_lea.vmem [#allocation6], %s1887_s16 }
  0xbc   : > { %s374_s14 = scalar_lea.sflag [#allocation7], %s373_s17 }
  0xbd   : > { %2380 = dma.done.wait (%p3117_p1), %s374_s14, 640  }
  0xbe   : > { %2382 = vsyncadd (%p3117_p1), %s374_s14, 4294966656  ;;  %s1889_s8 = sshll.u32 %s2758_s20, 3  ;;  %s392_s27 = scalar_lea.sflag [#allocation10], %s373_s17 }
  0xbf   : > { %s2778_s5 = scalar_lea.vmem [#allocation8], %s1889_s8  ;;  %s2780_s18 = scalar_lea.vmem [#allocation9], %s1887_s16 }
  0xc0   : > { %2384 = dma.done.wait (%p3117_p1), %s392_s27, 512  }
  0xc1   : > { %2386 = vsyncadd (%p3117_p1), %s392_s27, 4294966784  ;;  %p3118_p12 = scmp.eq.s32.totalorder %s2512_s30, 0 }
  0xc3   : > { %2388 = dma.done.wait (%p3118_p12), [#allocation10], 512   ;;  %p3119_p2 = pmov %p3118_p12 }
  0xc4   : > { %v2426_v0 = vmov 0.0   ;;  %vm2427_vm0 = vmmov 0   ;;  %v2428_v1 = vmov 2   ;;  %v2429_v2 = vmov 0   ;;  %v507_v3 = vld [vmem:[%s2769_s15] sm:$0xff]  ;;  %v1899_v4 = vld [vmem:[%s2769_s15 + $0x8] sm:$0xff] }
  0xc5   : > { %2390 = vsyncadd (%p3119_p2), [#allocation10], 4294966784  ;;  %1951 = vmatprep.subr.mxu0 %v2426_v0  ;;  %1961 = vmatprep.subr.mxu1 %v2426_v0  ;;  %vm515_vm1 = vcmask 64512   ;;  %v505_v5 = vld [vmem:[%s2762_s4] sm:$0xff]  ;;  %v1898_v7 = vld [vmem:[%s2762_s4 + $0x8] sm:$0xff]  ;;  %v2430_v10 = vmov 3   ;;  %v483_v25 = vlaneseq }
  0xc6   : > { %1953 = vmatprep.mubr.msk.f32.mxu0 %vm2427_vm0, %v2426_v0  ;;  %1963 = vmatprep.mubr.msk.f32.mxu1 %vm2427_vm0, %v2426_v0  ;;  %v506_v6 = vmul.f32 0.35355338, %v505_v5  ;;  %v508_v8 = vld [vmem:[%s2780_s18] sm:$0xff]  ;;  %v727_v9 = vmul.f32 0.35355338, %v1898_v7  ;;  %v2431_v11 = vmov 1  }
  0xc7   : > { %2123 = vset.pattern.permute.xlu1 %v2428_v1  ;;  %2121 = vset.pattern.permute.xlu0 %v2429_v2  ;;  %v1900_v12 = vld [vmem:[%s2780_s18 + $0x8] sm:$0xff]  ;;  %v2432_v13 = vmov 4   ;;  %v2433_v14 = vmov 5   ;;  %v2434_v15 = vmov 6   ;;  %v2435_v16 = vmov 7   ;;  %v2832_v18 = vld [vmem:[%s2778_s5] sm:$0xff] }
  0xc8   : > { %1952 = vmatpush3.xpose.msk.msra.mxu0 %vm515_vm1, %v507_v3  ;;  %1962 = vmatpush3.xpose.msk.msra.mxu1 %vm515_vm1, %v1899_v4  ;;  %v2436_v17 = vmov 8   ;;  %vm450_vm2 = vcmask 261120   ;;  %v484_v26 = vshrl.u32 %v483_v25, 7  ;;  %v489_v27 = vand.u32 127, %v483_v25  ;;  %s3120_s7 = sld [smem:[#allocation27_spill]]  ;;  %s3121_s21 = sld [smem:[#allocation28_spill]] }
  0xc9   : > { %599 = vperm.xlu1 %2123, %v508_v8   ;;  %511 = vperm.xlu0 %2121, %v508_v8   ;;  %v451_v19 = vsel %vm450_vm2, %v2832_v18, 0.0  ;;  %s2437_s6 = smov 120   ;;  %s2438_s24 = smov 112  }
  0xca   : > { %1956 = vmatprep.subr.mxu0 %v2426_v0  ;;  %1971 = vmatprep.subr.mxu1 %v2426_v0  ;;  %v490_v30 = vsub.s32 %v489_v27, %v484_v26  ;;  %s2439_s23 = smov 104   ;;  %s3122_s9 = sld [smem:[#allocation20_spill]] }
  0xcb   : > { %1954 = vmatmul.mubr.msk.f32.vlgmr.msra.gmra.mrb[0].mxu0 %vm515_vm1, %v506_v6  ;;  %1964 = vmatmul.mubr.msk.f32.vlgmr.msra.gmra.mrb[0].mxu1 %vm515_vm1, %v727_v9  ;;  %s3123_s12 = sld [smem:[#allocation21_spill]]  ;;  %s444_s26 = scalar_lea.vmem [#allocation12], %s1889_s8 }
  0xcc   : > { %1958 = vmatprep.mubr.msk.f32.mxu0 %vm2427_vm0, %v2426_v0  ;;  %1973 = vmatprep.mubr.msk.f32.mxu1 %vm2427_vm0, %v2426_v0  ;;  %vm491_vm3 = vcmp.gt.s32.totalorder %v490_v30, 4294967292  ;;  %s1712_s1 = sshll.u32 %s444_s26, 4  ;;  %s3124_s0 = sld [smem:[#allocation30_spill]]  ;;  %s3009_s1 = int_to_ptr.vmem [resolvable:$true] %s1712_s1 }
  0xcd   : > { %2124 = vset.pattern.permute.xlu1 %v2430_v10  ;;  %2122 = vset.pattern.permute.xlu0 %v2431_v11  ;;  %v492_v33 = vsel %vm491_vm3, %v490_v30, 4294967292  ;;  %s1698_s17 = scalar_lea.sflag [#allocation5], %s2758_s20  ;;  %s2323_s14 = scalar_lea.vmem %s3009_s1, 128 }
  0xce   : > { %605 = vperm.xlu1 %2124, %v508_v8   ;;  %593 = vperm.xlu0 %2122, %v508_v8   ;;  %vm493_vm4 = vcmp.lt.s32.totalorder %v492_v33, 4  ;;  %p2324_p10 = scmp.ne.s32.totalorder %s3009_s1, %s2323_s14 }
  0xcf   : > { %v494_v36 = vsel %vm493_vm4, %v492_v33, 4 }
  0xd0   : > { %v2836_v39 = vadd.s32 4, %v494_v36  ;;  %s1921_s22 = sshll.u32 %s3122_s9, 7 }
  0xd1   : > { %p3125_p13 = scmp.ne.s32.totalorder %s3123_s12, 0 }
  0xd2   : > { %2125 = vset.pattern.permute.xlu1 %v2429_v2  ;;  %2126 = vset.pattern.permute.xlu0 %v2432_v13  ;;  %vm496_vm5 = vcmp.eq.s32.totalorder %v2836_v39, 0  ;;  %vm497_vm6 = vcmp.eq.s32.totalorder %v2836_v39, 1  ;;  %vm498_vm7 = vcmp.eq.s32.totalorder %v2836_v39, 2  ;;  %vm499_vm8 = vcmp.eq.s32.totalorder %v2836_v39, 3 }
  0xd3   : > { %734 = vperm.xlu1 %2125, %v1900_v12   ;;  %611 = vperm.xlu0 %2126, %v508_v8   ;;  %vm500_vm9 = vcmp.eq.s32.totalorder %v2836_v39, 4  ;;  %vm501_vm10 = vcmp.eq.s32.totalorder %v2836_v39, 5  ;;  %vm502_vm11 = vcmp.eq.s32.totalorder %v2836_v39, 6  ;;  %vm503_vm12 = vcmp.eq.s32.totalorder %v2836_v39, 7  ;;  %p2325_p3 = pnand %p2324_p10, %p3125_p13 }
  0xd4   : > { %vm504_vm13 = vcmp.eq.s32.totalorder %v2836_v39, 8 }
  0xd5   : > { %p2326_p11 = pneg %p2325_p3 }
  0xd7   : > { %2127 = vset.pattern.permute.xlu1 %v2431_v11  ;;  %2129 = vset.pattern.permute.xlu0 %v2428_v1 }
  0xd8   : > { %815 = vperm.xlu1 %2127, %v1900_v12   ;;  %821 = vperm.xlu0 %2129, %v1900_v12  }
  0xdc   : > { %2128 = vset.pattern.permute.xlu1 %v2433_v14  ;;  %2134 = vset.pattern.permute.xlu0 %v2433_v14 }
  0xdd   : > { %617 = vperm.xlu1 %2128, %v508_v8   ;;  %839 = vperm.xlu0 %2134, %v1900_v12  }
  0xe1   : > { %2130 = vset.pattern.permute.xlu1 %v2434_v15  ;;  %2135 = vset.pattern.permute.xlu0 %v2435_v16 }
  0xe2   : > { %623 = vperm.xlu1 %2130, %v508_v8   ;;  %629 = vperm.xlu0 %2135, %v508_v8  }
  0xe6   : > { %2131 = vset.pattern.permute.xlu1 %v2430_v10  ;;  %851 = vperm.xlu0 %2135, %v1900_v12  }
  0xe7   : > { %827 = vperm.xlu1 %2131, %v1900_v12  }
  0xea   : > { %2137 = vset.pattern.permute.xlu0 %v2436_v17 }
  0xeb   : > { %2132 = vset.pattern.permute.xlu1 %v2432_v13  ;;  %857 = vperm.xlu0 %2137, %v1900_v12  }
  0xec   : > { %833 = vperm.xlu1 %2132, %v1900_v12  }
  0xef   : > { %2140 = vset.pattern.permute.xlu0 %v2428_v1 }
  0xf0   : > { %2133 = vset.pattern.permute.xlu1 %v2436_v17 }
  0xf1   : > { %635 = vperm.xlu1 %2133, %v508_v8  }
  0xf5   : > { %2136 = vset.pattern.permute.xlu1 %v2434_v15 }
  0xf6   : > { %845 = vperm.xlu1 %2136, %v1900_v12  }
  0xfa   : > { %2138 = vset.pattern.permute.xlu1 %v2429_v2 }
 0x11a   : > { %452 = vadd.xlane.f32.xlu1 %v451_v19 }
 0x148   : > { %v600_v20 = vpop.permute.xlu1 %599  ;;  %v512_v24 = vpop.permute.xlu0 %511 }
 0x149   : > { %v514_v43 = vsel %vm496_vm5, %v512_v24, 0.0  ;;  %v602_v55 = vsel %vm498_vm7, %v600_v20, 0.0 }
 0x14d   : > { %v606_v21 = vpop.permute.xlu1 %605  ;;  %v594_v29 = vpop.permute.xlu0 %593 }
 0x14e   : > { %v596_v51 = vsel %vm497_vm6, %v594_v29, 0.0  ;;  %v608_v60 = vsel %vm499_vm8, %v606_v21, 0.0 }
 0x152   : > { %v735_v22 = vpop.permute.xlu1 %734  ;;  %v612_v32 = vpop.permute.xlu0 %611 }
 0x153   : > { %v737_v42 = vsel %vm496_vm5, %v735_v22, 0.0  ;;  %v614_v4 = vsel %vm500_vm9, %v612_v32, 0.0 }
 0x157   : > { %v816_v23 = vpop.permute.xlu1 %815  ;;  %v822_v35 = vpop.permute.xlu0 %821 }
 0x158   : > { %v818_v50 = vsel %vm497_vm6, %v816_v23, 0.0  ;;  %v824_v52 = vsel %vm498_vm7, %v822_v35, 0.0 }
 0x15c   : > { %v618_v28 = vpop.permute.xlu1 %617  ;;  %v840_v38 = vpop.permute.xlu0 %839 }
 0x15d   : > { %v620_v8 = vsel %vm501_vm10, %v618_v28, 0.0  ;;  %v842_v9 = vsel %vm501_vm10, %v840_v38, 0.0 }
 0x161   : > { %v624_v31 = vpop.permute.xlu1 %623  ;;  %v630_v41 = vpop.permute.xlu0 %629 }
 0x162   : > { %v626_v22 = vsel %vm502_vm11, %v624_v31, 0.0  ;;  %v632_v24 = vsel %vm503_vm12, %v630_v41, 0.0 }
 0x165   : > { %v852_v59 = vpop.permute.xlu0 %851 }
 0x166   : > { %v828_v34 = vpop.permute.xlu1 %827  ;;  %v854_v25 = vsel %vm503_vm12, %v852_v59, 0.0  ;;  %v1908_v59 = vld [vmem:[%s2780_s18 + $0x10] sm:$0xff] }
 0x167   : > { %v830_v61 = vsel %vm499_vm8, %v828_v34, 0.0 }
 0x16a   : > { %v858_v21 = vpop.permute.xlu0 %857 }
 0x16b   : > { %v834_v37 = vpop.permute.xlu1 %833  ;;  %v860_v29 = vsel %vm504_vm13, %v858_v21, 0.0  ;;  %v724_v21 = vld [vmem:[#allocation11] sm:$0xff] }
 0x16c   : > { %v836_v3 = vsel %vm500_vm9, %v834_v37, 0.0 }
 0x170   : > { %v636_v40 = vpop.permute.xlu1 %635 }
 0x171   : > { %v638_v32 = vsel %vm504_vm13, %v636_v40, 0.0 }
 0x175   : > { %v846_v56 = vpop.permute.xlu1 %845 }
 0x176   : > { %v848_v23 = vsel %vm502_vm11, %v846_v56, 0.0 }
 0x19e   : > { %v588_v44 = vpop.f32.mrb[0].mxu0  ;;  %v810_v45 = vpop.f32.mrb[0].mxu1 }
 0x19f   : > { %v589_v46 = vadd.f32 %v588_v44, %v514_v43  ;;  %v811_v47 = vadd.f32 %v810_v45, %v737_v42  ;;  %v1955_v48 = vpop.f32.mrb[1].mxu0  ;;  %v1965_v49 = vpop.f32.mrb[1].mxu1 }
 0x1a1   : > { %v597_v53 = vadd.f32 %v596_v51, %v589_v46  ;;  %v819_v54 = vadd.f32 %v818_v50, %v811_v47 }
 0x1a3   : > { %v603_v57 = vadd.f32 %v602_v55, %v597_v53  ;;  %v825_v58 = vadd.f32 %v824_v52, %v819_v54  ;;  %v1893_v52 = vld [vmem:[%s3120_s7] ss:$0 sm:$0xff] }
 0x1a4   : > { %v1894_v55 = vld [vmem:[%s3121_s21] ss:$0 sm:$0xff] }
 0x1a5   : > { %v609_v62 = vadd.f32 %v608_v60, %v603_v57  ;;  %v831_v63 = vadd.f32 %v830_v61, %v825_v58 }
 0x1a7   : > { %v837_v5 = vadd.f32 %v836_v3, %v831_v63  ;;  %v615_v6 = vadd.f32 %v614_v4, %v609_v62  ;;  %v453_v7 = vpop.xlane.xlu1 %452 }
 0x1a8   : > { %v455_v12 = vmul.f32 0.03125, %v453_v7  ;;  %v950_v7 = vld [vmem:[#allocation11 + $0x8] sm:$0xff] }
 0x1a9   : > { %v843_v19 = vadd.f32 %v842_v9, %v837_v5  ;;  %v621_v20 = vadd.f32 %v620_v8, %v615_v6  ;;  %v1907_v5 = vld [vmem:[%s2769_s15 + $0x10] sm:$0xff]  ;;  %1972 = vmatpush3.msra.mxu1 %v950_v7 }
 0x1aa   : > { %v456_v28 = vsub.f32 %v2832_v18, %v455_v12  ;;  %1976 = vmatprep.subr.mxu1 %v2426_v0 }
 0x1ab   : > { %v627_v26 = vadd.f32 %v626_v22, %v621_v20  ;;  %v849_v27 = vadd.f32 %v848_v23, %v843_v19 }
 0x1ac   : > { %v457_v35 = vmul.f32 %v456_v28, %v456_v28 }
 0x1ad   : > { %v633_v30 = vadd.f32 %v632_v24, %v627_v26  ;;  %v855_v31 = vadd.f32 %v854_v25, %v849_v27 }
 0x1ae   : > { %v458_v38 = vsel %vm450_vm2, %v457_v35, 0.0 }
 0x1af   : > { %v861_v33 = vadd.f32 %v860_v29, %v855_v31  ;;  %v639_v34 = vadd.f32 %v638_v32, %v633_v30 }
 0x1b1   : > { %v640_v36 = vsel %vm515_vm1, %v639_v34, -inf  ;;  %v862_v37 = vsel %vm515_vm1, %v861_v33, -inf }
 0x1b2   : > { %641 = vmax.xlane.f32.xlu0 %v640_v36  ;;  %863 = vmax.xlane.f32.xlu1 %v862_v37 }
 0x1b6   : > { %459 = vadd.xlane.f32.xlu1 %v458_v38 }
 0x23f   : > { %v642_v18 = vpop.xlane.xlu0 %641  ;;  %v864_v41 = vpop.xlane.xlu1 %863 }
 0x240   : > { %v643_v42 = vsub.f32 %v639_v34, %v642_v18  ;;  %v865_v43 = vsub.f32 %v861_v33, %v864_v41 }
 0x242   : > { %v644_v44 = vmul.f32 1.442695, %v643_v42  ;;  %v866_v45 = vmul.f32 1.442695, %v865_v43 }
 0x243   : > { %v460_v46 = vpop.xlane.xlu1 %459 }
 0x244   : > { %2157 = vpow2.f32 %v644_v44  ;;  %v461_v40 = vmul.f32 0.03125, %v460_v46 }
 0x245   : > { %2159 = vpow2.f32 %v866_v45 }
 0x246   : > { %v462_v47 = vadd.f32 1e-05, %v461_v40 }
 0x248   : > { %2161 = vrsqrt.f32 %v462_v47 }
 0x24e   : > { %v2158_v48 = vpop.eup %2157 }
 0x24f   : > { %v646_v49 = vsel %vm515_vm1, %v2158_v48, 0.0  ;;  %v2160_v50 = vpop.eup %2159 }
 0x250   : > { %647 = vadd.xlane.f32.xlu1 %v646_v49  ;;  %v868_v54 = vsel %vm515_vm1, %v2160_v50, 0.0 }
 0x252   : > { %v2162_v51 = vpop.eup %2161 }
 0x253   : > { %v464_v53 = vmul.f32 %v2162_v51, %v456_v28 }
 0x254   : > { %869 = vadd.xlane.f32.xlu1 %v868_v54 }
 0x255   : > { %v472_v56 = vmul.f32 %v1893_v52, %v464_v53 }
 0x257   : > { %v480_v57 = vadd.f32 %v1894_v55, %v472_v56 }
 0x259   : > { %481 = vst.msk [vmem:[#allocation2] sm:$0xff] %vm450_vm2, %v480_v57  ;;  %v1915_v57 = vld [vmem:[%s2780_s18 + $0x18] sm:$0xff] }
 0x260   : > { %v2896_v58 = vld [vmem:[#allocation2] sm:$0xff] }
 0x261   : > { %874 = vrot.lane.b32.xlu0 %v2896_v58, %s2437_s6  ;;  %1957 = vmatpush3.msra.mxu0 %v2896_v58 }
 0x262   : > { %1966 = vmatprep.subr.mxu0 %v2426_v0 }
 0x265   : > { %1106 = vperm.xlu1 %2138, %v1908_v59   ;;  %1193 = vperm.xlu0 %2140, %v1908_v59  }
 0x269   : > { %2139 = vset.pattern.permute.xlu1 %v2431_v11  ;;  %2143 = vset.pattern.permute.xlu0 %v2433_v14 }
 0x26a   : > { %1187 = vperm.xlu1 %2139, %v1908_v59   ;;  %1211 = vperm.xlu0 %2143, %v1908_v59  }
 0x26e   : > { %2141 = vset.pattern.permute.xlu1 %v2430_v10  ;;  %2146 = vset.pattern.permute.xlu0 %v2436_v17 }
 0x26f   : > { %1199 = vperm.xlu1 %2141, %v1908_v59   ;;  %1229 = vperm.xlu0 %2146, %v1908_v59  }
 0x273   : > { %2142 = vset.pattern.permute.xlu1 %v2432_v13  ;;  %2147 = vset.pattern.permute.xlu0 %v2429_v2 }
 0x274   : > { %1205 = vperm.xlu1 %2142, %v1908_v59  }
 0x278   : > { %2144 = vset.pattern.permute.xlu1 %v2434_v15 }
 0x279   : > { %1217 = vperm.xlu1 %2144, %v1908_v59  }
 0x27d   : > { %2145 = vset.pattern.permute.xlu1 %v2435_v16 }
 0x27e   : > { %1223 = vperm.xlu1 %2145, %v1908_v59   ;;  %v1913_v59 = vld [vmem:[%s2762_s4 + $0x18] sm:$0xff] }
 0x282   : > { %2148 = vset.pattern.permute.xlu1 %v2431_v11  ;;  %v1906_v11 = vld [vmem:[%s2762_s4 + $0x10] sm:$0xff]  ;;  %s3007_s4 = scalar_lea.hbm %s3124_s0, %s1921_s22 }
 0x283   : > { %v1099_v6 = vmul.f32 0.35355338, %v1906_v11 }
 0x2d3   : > { %v875_v3 = vpop.permute.xlu0 %874 }
 0x2dd   : > { %v648_v60 = vpop.xlane.xlu1 %647 }
 0x2de   : > { %2163 = vrcp.f32 %v648_v60 }
 0x2e1   : > { %v870_v61 = vpop.xlane.xlu1 %869 }
 0x2e2   : > { %2165 = vrcp.f32 %v870_v61  ;;  %v1914_v61 = vld [vmem:[%s2769_s15 + $0x18] sm:$0xff]  ;;  %s2440_s15 = smov [#allocation12]  }
 0x2e3   : > { %s2327_s8 = sshll.u32 %s2440_s15, 4  ;;  %s2328_s8 = int_to_ptr.vmem [resolvable:$false] %s2327_s8 }
 0x2e4   : > { %v1194_v25 = vpop.permute.xlu0 %1193  ;;  %s2329_s5 = scalar_lea.vmem %s2328_s8, 256  ;;  %p2330_p5 = scmp.lt.s32.totalorder %s3009_s1, %s2328_s8 }
 0x2e5   : > { %v1107_v8 = vpop.permute.xlu1 %1106  ;;  %v1196_v31 = vsel %vm498_vm7, %v1194_v25, 0.0  ;;  %p2331_p9 = scmp.lt.s32.totalorder %s2329_s5, %s2323_s14 }
 0x2e6   : > { %v1109_v26 = vsel %vm496_vm5, %v1107_v8, 0.0 }
 0x2e7   : > { %p2332_p8 = por %p2331_p9, %p2330_p5 }
 0x2e8   : > { %v2164_v62 = vpop.eup %2163 }
 0x2e9   : > { %v650_v63 = vmul.f32 %v2164_v62, %v2158_v48  ;;  %v1188_v9 = vpop.permute.xlu1 %1187  ;;  %v1212_v35 = vpop.permute.xlu0 %1211  ;;  %p2333_p7 = pnand %p2332_p8, %p2326_p11 }
 0x2ea   : > { %v1190_v30 = vsel %vm497_vm6, %v1188_v9, 0.0  ;;  %v1214_v18 = vsel %vm501_vm10, %v1212_v35, 0.0 }
 0x2eb   : > { %1959 = vmatmul.mubr.msk.f32.vlgmr.msra.gmra.mrb[2].mxu0 %vm515_vm1, %v650_v63 }
 0x2ec   : > { %v2166_v2 = vpop.eup %2165  ;;  %1967 = vmatpush3.msra.mxu0 %v875_v3  ;;  %1968 = vmatprep.mubr.msk.f32.mxu0 %vm2427_vm0, %v2426_v0 }
 0x2ed   : > { %v872_v4 = vmul.f32 %v2166_v2, %v2160_v50  ;;  %1981 = vmatprep.subr.mxu0 %v2426_v0 }
 0x2ee   : > { %v1200_v20 = vpop.permute.xlu1 %1199  ;;  %v1230_v44 = vpop.permute.xlu0 %1229 }
 0x2ef   : > { %1969 = vmatmul.mubr.msk.f32.vlgmr.msra.gmra.mrb[4].mxu0 %vm515_vm1, %v872_v4  ;;  %v1202_v36 = vsel %vm499_vm8, %v1200_v20, 0.0  ;;  %v1232_v47 = vsel %vm504_vm13, %v1230_v44, 0.0 }
 0x2f0   : > { %1983 = vmatprep.mubr.msk.f32.mxu0 %vm2427_vm0, %v2426_v0 }
 0x2f3   : > { %1982 = vmatpush3.xpose.msk.msra.mxu0 %vm515_vm1, %v1907_v5  ;;  %v1206_v24 = vpop.permute.xlu1 %1205 }
 0x2f4   : > { %1986 = vmatprep.subr.mxu0 %v2426_v0  ;;  %v1208_v38 = vsel %vm500_vm9, %v1206_v24, 0.0 }
 0x2f6   : > { %1984 = vmatmul.mubr.msk.f32.vlgmr.msra.gmra.mrb[6].mxu0 %vm515_vm1, %v1099_v6 }
 0x2f7   : > { %1988 = vmatprep.mubr.msk.f32.mxu0 %vm2427_vm0, %v2426_v0 }
 0x2f8   : > { %v1218_v33 = vpop.permute.xlu1 %1217 }
 0x2f9   : > { %v1220_v45 = vsel %vm502_vm11, %v1218_v33, 0.0 }
 0x2fd   : > { %v1224_v42 = vpop.permute.xlu1 %1223 }
 0x2fe   : > { %v1226_v46 = vsel %vm503_vm12, %v1224_v42, 0.0 }
 0x3be   : > { %v720_v12 = vpop.f32.mrb[2].mxu0 }
 0x3bf   : > { %v1960_v19 = vpop.f32.mrb[3].mxu0 }
 0x3c2   : > { %v946_v22 = vpop.f32.mrb[4].mxu0 }
 0x3c3   : > { %v1970_v23 = vpop.f32.mrb[5].mxu0  ;;  %1974 = vmatmul.mubr.msk.f32.vlgmr.msra.gmra.mrb[2].mxu1 %vm515_vm1, %v946_v22 }
 0x3c4   : > { %1977 = vmatpush3.msra.mxu1 %v724_v21  ;;  %1978 = vmatprep.mubr.msk.f32.mxu1 %vm2427_vm0, %v2426_v0 }
 0x3c5   : > { %1991 = vmatprep.subr.mxu1 %v2426_v0 }
 0x3c9   : > { %v1182_v27 = vpop.f32.mrb[6].mxu0 }
 0x3ca   : > { %v1183_v28 = vadd.f32 %v1182_v27, %v1109_v26  ;;  %v1985_v29 = vpop.f32.mrb[7].mxu0 }
 0x3cb   : > { %1979 = vmatmul.mubr.msk.f32.vlgmr.msra.gmra.mrb[2].mxu1 %vm515_vm1, %v720_v12 }
 0x3cc   : > { %v1191_v32 = vadd.f32 %v1190_v30, %v1183_v28  ;;  %1993 = vmatprep.mubr.msk.f32.mxu1 %vm2427_vm0, %v2426_v0 }
 0x3ce   : > { %v1197_v34 = vadd.f32 %v1196_v31, %v1191_v32 }
 0x3d0   : > { %v1203_v37 = vadd.f32 %v1202_v36, %v1197_v34 }
 0x3d2   : > { %v1209_v41 = vadd.f32 %v1208_v38, %v1203_v37 }
 0x3d4   : > { %v1215_v43 = vadd.f32 %v1214_v18, %v1209_v41 }
 0x3d6   : > { %v1221_v40 = vadd.f32 %v1220_v45, %v1215_v43 }
 0x3d8   : > { %v1227_v48 = vadd.f32 %v1226_v46, %v1221_v40 }
 0x3da   : > { %v1233_v49 = vadd.f32 %v1232_v47, %v1227_v48 }
 0x3dc   : > { %v1234_v50 = vsel %vm515_vm1, %v1233_v49, -inf }
 0x3dd   : > { %1235 = vmax.xlane.f32.xlu1 %v1234_v50 }
 0x3ee   : > { %1245 = vrot.lane.b32.xlu1 %v2896_v58, %s2438_s24 }
 0x3f2   : > { %1486 = vperm.xlu1 %2148, %v1915_v57  }
 0x3f6   : > { %2149 = vset.pattern.permute.xlu1 %v2428_v1 }
 0x3f7   : > { %1492 = vperm.xlu1 %2149, %v1915_v57  }
 0x3fb   : > { %2150 = vset.pattern.permute.xlu1 %v2430_v10 }
 0x3fc   : > { %1498 = vperm.xlu1 %2150, %v1915_v57  }
 0x400   : > { %2151 = vset.pattern.permute.xlu1 %v2432_v13  ;;  %v1398_v13 = vmul.f32 0.35355338, %v1913_v59 }
 0x401   : > { %1504 = vperm.xlu1 %2151, %v1915_v57  }
 0x405   : > { %2152 = vset.pattern.permute.xlu1 %v2433_v14  ;;  %v1321_v14 = vld [vmem:[#allocation11 + $0x10] sm:$0xff] }
 0x406   : > { %1510 = vperm.xlu1 %2152, %v1915_v57   ;;  %1992 = vmatpush3.msra.mxu1 %v1321_v14 }
 0x407   : > { %2001 = vmatprep.subr.mxu1 %v2426_v0 }
 0x40a   : > { %2153 = vset.pattern.permute.xlu1 %v2434_v15 }
 0x40b   : > { %1516 = vperm.xlu1 %2153, %v1915_v57  }
 0x40f   : > { %2154 = vset.pattern.permute.xlu1 %v2435_v16 }
 0x410   : > { %1522 = vperm.xlu1 %2154, %v1915_v57  }
 0x414   : > { %2155 = vset.pattern.permute.xlu1 %v2436_v17 }
 0x415   : > { %1528 = vperm.xlu1 %2155, %v1915_v57  }
 0x46a   : > { %v1236_v51 = vpop.xlane.xlu1 %1235 }
 0x46b   : > { %v1237_v52 = vsub.f32 %v1233_v49, %v1236_v51 }
 0x46d   : > { %v1238_v53 = vmul.f32 1.442695, %v1237_v52 }
 0x46e   : > { %v1246_v54 = vpop.permute.xlu1 %1245 }
 0x46f   : > { %2167 = vpow2.f32 %v1238_v53  ;;  %1987 = vmatpush3.msra.mxu0 %v1246_v54 }
 0x470   : > { %1996 = vmatprep.subr.mxu0 %v2426_v0 }
 0x472   : > { %v1487_v15 = vpop.permute.xlu1 %1486 }
 0x473   : > { %v1489_v9 = vsel %vm497_vm6, %v1487_v15, 0.0 }
 0x476   : > { %v1493_v16 = vpop.permute.xlu1 %1492 }
 0x477   : > { %v1495_v19 = vsel %vm498_vm7, %v1493_v16, 0.0 }
 0x479   : > { %v2168_v55 = vpop.eup %2167 }
 0x47a   : > { %v1240_v56 = vsel %vm515_vm1, %v2168_v55, 0.0 }
 0x47b   : > { %1241 = vadd.xlane.f32.xlu0 %v1240_v56 }
 0x491   : > { %1405 = vperm.xlu0 %2147, %v1915_v57  }
 0x495   : > { %2156 = vset.pattern.permute.xlu0 %v2436_v17  ;;  %v1499_v17 = vpop.permute.xlu1 %1498 }
 0x496   : > { %v1501_v22 = vsel %vm499_vm8, %v1499_v17, 0.0 }
 0x499   : > { %v1505_v62 = vpop.permute.xlu1 %1504 }
 0x49a   : > { %v1507_v24 = vsel %vm500_vm9, %v1505_v62, 0.0 }
 0x49d   : > { %v1511_v63 = vpop.permute.xlu1 %1510 }
 0x49e   : > { %v1513_v26 = vsel %vm501_vm10, %v1511_v63, 0.0 }
 0x4a1   : > { %v1517_v5 = vpop.permute.xlu1 %1516 }
 0x4a2   : > { %v1519_v29 = vsel %vm502_vm11, %v1517_v5, 0.0 }
 0x4a5   : > { %v1523_v21 = vpop.permute.xlu1 %1522 }
 0x4a6   : > { %v1525_v31 = vsel %vm503_vm12, %v1523_v21, 0.0 }
 0x4a9   : > { %v1529_v28 = vpop.permute.xlu1 %1528 }
 0x4aa   : > { %v1531_v32 = vsel %vm504_vm13, %v1529_v28, 0.0 }
 0x508   : > { %v1242_v1 = vpop.xlane.xlu0 %1241 }
 0x509   : > { %2169 = vrcp.f32 %v1242_v1 }
 0x510   : > { %v1406_v3 = vpop.permute.xlu0 %1405 }
 0x511   : > { %v1408_v11 = vsel %vm496_vm5, %v1406_v3, 0.0 }
 0x513   : > { %v2170_v10 = vpop.eup %2169 }
 0x514   : > { %v1244_v60 = vmul.f32 %v2170_v10, %v2168_v55 }
 0x516   : > { %1989 = vmatmul.mubr.msk.f32.vlgmr.msra.gmra.mrb[8].mxu0 %vm515_vm1, %v1244_v60 }
 0x517   : > { %1997 = vmatpush3.xpose.msk.msra.mxu0 %vm515_vm1, %v1914_v61  ;;  %1998 = vmatprep.mubr.msk.f32.mxu0 %vm2427_vm0, %v2426_v0 }
 0x51a   : > { %1999 = vmatmul.mubr.msk.f32.vlgmr.msra.gmra.mrb[10].mxu0 %vm515_vm1, %v1398_v13 }
 0x5e9   : > { %v1317_v2 = vpop.f32.mrb[8].mxu0 }
 0x5ea   : > { %v1990_v4 = vpop.f32.mrb[9].mxu0  ;;  %1994 = vmatmul.mubr.msk.f32.vlgmr.msra.gmra.mrb[2].mxu1 %vm515_vm1, %v1317_v2 }
 0x5eb   : > { %2003 = vmatprep.mubr.msk.f32.mxu1 %vm2427_vm0, %v2426_v0 }
 0x5ed   : > { %v1481_v6 = vpop.f32.mrb[10].mxu0 }
 0x5ee   : > { %v1482_v7 = vadd.f32 %v1481_v6, %v1408_v11  ;;  %v2000_v8 = vpop.f32.mrb[11].mxu0 }
 0x5f0   : > { %v1490_v12 = vadd.f32 %v1489_v9, %v1482_v7 }
 0x5f2   : > { %v1496_v20 = vadd.f32 %v1495_v19, %v1490_v12 }
 0x5f4   : > { %v1502_v23 = vadd.f32 %v1501_v22, %v1496_v20 }
 0x5f6   : > { %v1508_v25 = vadd.f32 %v1507_v24, %v1502_v23 }
 0x5f8   : > { %v1514_v27 = vadd.f32 %v1513_v26, %v1508_v25 }
 0x5fa   : > { %v1520_v30 = vadd.f32 %v1519_v29, %v1514_v27 }
 0x5fc   : > { %v1526_v33 = vadd.f32 %v1525_v31, %v1520_v30 }
 0x5fe   : > { %v1532_v34 = vadd.f32 %v1531_v32, %v1526_v33 }
 0x600   : > { %v1533_v35 = vsel %vm515_vm1, %v1532_v34, -inf }
 0x601   : > { %1534 = vmax.xlane.f32.xlu0 %v1533_v35 }
 0x617   : > { %1544 = vrot.lane.b32.xlu0 %v2896_v58, %s2439_s23  ;;  %v1620_v58 = vld [vmem:[#allocation11 + $0x18] sm:$0xff] }
 0x68e   : > { %v1535_v36 = vpop.xlane.xlu0 %1534 }
 0x68f   : > { %v1536_v37 = vsub.f32 %v1532_v34, %v1535_v36 }
 0x691   : > { %v1537_v38 = vmul.f32 1.442695, %v1536_v37 }
 0x692   : > { %v1545_v18 = vpop.permute.xlu0 %1544 }
 0x693   : > { %2171 = vpow2.f32 %v1537_v38  ;;  %2002 = vmatpush3.msra.mxu1 %v1545_v18 }
 0x694   : > { %2006 = vmatprep.subr.mxu1 %v2426_v0 }
 0x69d   : > { %v2172_v39 = vpop.eup %2171 }
 0x69e   : > { %v1539_v41 = vsel %vm515_vm1, %v2172_v39, 0.0 }
 0x69f   : > { %1540 = vadd.xlane.f32.xlu1 %v1539_v41 }
 0x72c   : > { %v1541_v42 = vpop.xlane.xlu1 %1540 }
 0x72d   : > { %2173 = vrcp.f32 %v1541_v42 }
 0x737   : > { %v2174_v43 = vpop.eup %2173 }
 0x738   : > { %v1543_v44 = vmul.f32 %v2174_v43, %v2172_v39 }
 0x73a   : > { %2004 = vmatmul.mubr.msk.f32.vlgmr.msra.gmra.mrb[4].mxu1 %vm515_vm1, %v1543_v44 }
 0x73b   : > { %2007 = vmatpush3.msra.mxu1 %v1620_v58  ;;  %2008 = vmatprep.mubr.msk.f32.mxu1 %vm2427_vm0, %v2426_v0 }
 0x80d   : > { %v1616_v45 = vpop.f32.mrb[4].mxu1 }
 0x80e   : > { %v2005_v46 = vpop.f32.mrb[5].mxu1  ;;  %2009 = vmatmul.mubr.msk.f32.vlgmr.msra.gmra.mrb[2].mxu1 %vm515_vm1, %v1616_v45 }
 0x8e1   : > { %v1690_v40 = vpop.f32.mrb[2].mxu1 }
 0x8e2   : > { %1696 = vst.msk [vmem:[%s444_s26] sm:$0xff] %vm450_vm2, %v1690_v40  ;;  %v2010_v0 = vpop.f32.mrb[3].mxu1 }
 0x8e3   : > { %2336 = shalt.err (!%p2333_p7)
}
 0x8e4   : > { %s2337_s20 = scalar_lea.hbm %s3007_s4, 128  ;;  %s2341_s30 = scalar_lea.hbm %s3124_s0, 256 }
 0x8e5   : > { %p2338_p4 = scmp.ne.s32.totalorder %s3007_s4, %s2337_s20  ;;  %p2342_p1 = scmp.lt.u32.totalorder %s3007_s4, %s3124_s0 }
 0x8e6   : > { %p2343_p12 = scmp.lt.u32.totalorder %s2341_s30, %s2337_s20  ;;  %p2345_p10 = scmp.lt.u32.totalorder %s2337_s20, %s3007_s4 }
 0x8e7   : > { %p2339_p6 = pnand %p2338_p4, %p3125_p13 }
 0x8e8   : > { %p2344_p2 = por %p2343_p12, %p2342_p1 }
 0x8e9   : > { %p2340_p0 = pneg %p2339_p6 }
 0x8ea   : > { %p2346_p3 = por %p2345_p10, %p2344_p2 }
 0x8ec   : > { %p2347_p11 = pnand %p2346_p3, %p2340_p0 }
 0x8ee   : > { %2350 = shalt.err (!%p2347_p11)
}
 0x8ef   : > { %2029 = dma.vmem_to_hbm [thread:$0]  (%p3125_p13), %s3009_s1, 128, %s3007_s4, %s1698_s17  }
 0x8f0 PF: > { %s3126_s10 = sld [smem:[#allocation18_spill]]  ;;  %s3127_s13 = sld [smem:[#allocation22_spill]] }
 0x8f1   : > { %p3129_p9 = scmp.ge.s32.totalorder %s2417_s29, 2 }
 0x8f6   : > { %s1724_s21 = sand.u32 1, %s3126_s10   ;;  %p3128_p5 = scmp.ne.s32.totalorder %s3127_s13, 0 }
 0x8f7   : > { %s1725_s6 = scalar_lea.sflag [#allocation5], %s1724_s21 }
 0x8f8   : > { %p2049_p8 = pnand %p3129_p9, %p3128_p5 }
 0x8fa   : > { %2392 = dma.done.wait (!%p2049_p8), %s1725_s6, 128  }
 0x8fb   : > { %2394 = vsyncadd (!%p2049_p8), %s1725_s6, 4294967168  ;;  %s29_s29 = sadd.s32 1, %s2417_s29   ;;  %s3130_s23 = sld [smem:[#allocation19_spill]] }
 0x8fc   : > { %p26_p7 = scmp.ge.s32.totalorder %s29_s29, 4   ;;  %s3131_s26 = sld [smem:[#allocation24_spill]] }
 0x8fd   : > { %s3132_s9 = sld [smem:[#allocation23_spill]]  ;;  %s3133_s24 = smov %s2401_s25 }
 0x8fe   : > { %s3135_s27 = smov %s2413_s28  ;;  %28 = sbr.rel (!%p26_p7) target bundleno = 17 (0x11), region = 147 }
 0x901   : > { %s3134_s25 = smov %s3130_s23 }
 0x903   : > { %s3136_s28 = smov %s3132_s9 }
 0x905   :  { %1730 = vsyncpa [#allocation4], 1 }
 0x906   :  { %1732 = vsyncpa [#allocation4 + $0x1], 1 }
 0x907   :  { %1733 = vsyncpa [#allocation7], 1 }
 0x908   :  { %1735 = vsyncpa [#allocation7 + $0x1], 1 }
 0x909   :  { %1736 = vsyncpa [#allocation10], 1 }
 0x90a   :  { %1738 = vsyncpa [#allocation10 + $0x1], 1 }
 0x90b   :  { %1739 = vsyncpa [#allocation5], 1 }
 0x90c   :  { %1741 = vsyncpa [#allocation5 + $0x1], 1 }

</bundles_post_ra>
